<compile_context>
chip_gen: v7x
topology: tpu7x:2x2x1
jax: 0.10.0
libtpu: 0.0.40
codegen_flags: <defaults>
</compile_context>

<pallas_src>
import math

import jax
import jax.numpy as jnp
from jax.experimental import pallas as pl
from jax.experimental.pallas import tpu as pltpu  # noqa: F401  (TPU backend assumed)

# ---------------- small synthetic BERT config ----------------
VOCAB = 100
MAX_POS = 64
TYPE_VOCAB = 2
HIDDEN = 32
NUM_HEADS = 2
HEAD_DIM = HIDDEN // NUM_HEADS
INTERMEDIATE = 64
NUM_LAYERS = 2
NUM_CLASSES = 2
LN_EPS = 1e-12  # BERT default


# ---------------- in-kernel helpers (traced) ----------------
def _layernorm(x, g, b):
    mean = jnp.mean(x, axis=-1, keepdims=True)
    var = jnp.mean(jnp.square(x - mean), axis=-1, keepdims=True)
    return (x - mean) * jax.lax.rsqrt(var + LN_EPS) * g + b


def _gelu(x):
    # exact (erf) GELU, matching HF BERT's default "gelu"
    return 0.5 * x * (1.0 + jax.lax.erf(x * (1.0 / math.sqrt(2.0))))


# ---------------- single fused Pallas kernel ----------------
def _bert_kernel(ids_ref, tok_ref, mask_ref,
                 wemb_ref, pemb_ref, temb_ref, eln_g_ref, eln_b_ref,
                 wqkv_ref, bqkv_ref, wo_ref, bo_ref, ln1g_ref, ln1b_ref,
                 w1_ref, b1_ref, w2_ref, b2_ref, ln2g_ref, ln2b_ref,
                 poolw_ref, poolb_ref, clsw_ref, clsb_ref,
                 o_ref):
    f32 = jnp.float32
    M = ids_ref.shape[0]          # B * S
    S = pemb_ref.shape[0]
    B = M // S
    H = HIDDEN

    # ---- embeddings: one-hot gathers on the MXU, fused sum + LayerNorm ----
    ids = ids_ref[...]                                                    # (M, 1) int32
    word_oh = (jax.lax.broadcasted_iota(jnp.int32, (M, VOCAB), 1) == ids).astype(f32)
    word = jnp.dot(word_oh, wemb_ref[...], preferred_element_type=f32)    # (M, H)

    tok = tok_ref[...]                                                    # (M, 1) int32
    type_oh = (jax.lax.broadcasted_iota(jnp.int32, (M, TYPE_VOCAB), 1) == tok).astype(f32)
    typ = jnp.dot(type_oh, temb_ref[...], preferred_element_type=f32)     # (M, H)

    pos = jnp.concatenate([pemb_ref[...]] * B, axis=0)                    # (M, H)

    x = _layernorm(word + pos + typ, eln_g_ref[...], eln_b_ref[...])      # (M, H)

    add_mask = mask_ref[...]      # (M, M) block-diagonal + HF key-padding additive mask
    scale = 1.0 / math.sqrt(HEAD_DIM)

    # ---- encoder layers: statically unrolled, weights stay in VMEM ----
    for l in range(NUM_LAYERS):
        qkv = jnp.dot(x, wqkv_ref[l], preferred_element_type=f32) + bqkv_ref[l]   # (M, 3H)
        ctx_heads = []
        for h in range(NUM_HEADS):
            q = qkv[:, h * HEAD_DIM:(h + 1) * HEAD_DIM]                    # (M, HD)
            k = qkv[:, H + h * HEAD_DIM:H + (h + 1) * HEAD_DIM]            # (M, HD)
            v = qkv[:, 2 * H + h * HEAD_DIM:2 * H + (h + 1) * HEAD_DIM]    # (M, HD)
            s = jnp.dot(q, k.T, preferred_element_type=f32) * scale + add_mask   # (M, M)
            s = s - jnp.max(s, axis=-1, keepdims=True)
            p = jnp.exp(s)
            p = p * pl.reciprocal(jnp.sum(p, axis=-1, keepdims=True), approx=True)
            ctx_heads.append(jnp.dot(p, v, preferred_element_type=f32))    # (M, HD)
        ctx = jnp.concatenate(ctx_heads, axis=-1)                          # (M, H) lane-dense

        attn_out = jnp.dot(ctx, wo_ref[l], preferred_element_type=f32) + bo_ref[l]
        x = _layernorm(attn_out + x, ln1g_ref[l], ln1b_ref[l])

        h1 = _gelu(jnp.dot(x, w1_ref[l], preferred_element_type=f32) + b1_ref[l])
        h2 = jnp.dot(h1, w2_ref[l], preferred_element_type=f32) + b2_ref[l]
        x = _layernorm(h2 + x, ln2g_ref[l], ln2b_ref[l])

    # ---- pooler ([CLS] row per batch) + classifier: single final store ----
    cls = jnp.concatenate([x[b * S:b * S + 1, :] for b in range(B)], axis=0)      # (B, H)
    pooled = jnp.tanh(jnp.dot(cls, poolw_ref[...], preferred_element_type=f32)
                      + poolb_ref[...])
    logits = jnp.dot(pooled, clsw_ref[...], preferred_element_type=f32) + clsb_ref[...]
    o_ref[...] = logits.astype(o_ref.dtype)


# ---------------- model glue (plain JAX; one pallas_call per forward) ----------------
def bert_forward(params, input_ids, attention_mask=None, token_type_ids=None):
    B, S = input_ids.shape
    M = B * S
    H = HIDDEN

    if attention_mask is None:
        attention_mask = jnp.ones((B, S), dtype=jnp.int32)
    if token_type_ids is None:
        token_type_ids = jnp.zeros((B, S), dtype=jnp.int32)

    ids2d = input_ids.reshape(M, 1).astype(jnp.int32)
    tok2d = token_type_ids.reshape(M, 1).astype(jnp.int32)

    # HF-style additive key-padding mask combined with a block-diagonal batch mask so the
    # whole (B*S) x (B*S) attention can be computed in one step per head.
    key_mask = (1.0 - attention_mask.astype(jnp.float32).reshape(M)) * -10000.0   # (M,)
    batch_ids = jnp.repeat(jnp.arange(B), S)                                      # (M,)
    add_mask = (jnp.where(batch_ids[:, None] == batch_ids[None, :], 0.0, -10000.0)
                + key_mask[None, :])                                              # (M, M)

    pos_emb_s = params["pos_emb"][:S]                                             # (S, H)

    # Stack per-layer weights; fuse wq|wk|wv into one (H, 3H) projection.
    def stk(name):
        return jnp.stack([lp[name] for lp in params["layers"]], axis=0)

    wqkv = jnp.stack([jnp.concatenate([lp["wq"], lp["wk"], lp["wv"]], axis=1)
                      for lp in params["layers"]], axis=0)                        # (L, H, 3H)
    bqkv = jnp.stack([jnp.concatenate([lp["bq"], lp["bk"], lp["bv"]])[None, :]
                      for lp in params["layers"]], axis=0)                        # (L, 1, 3H)
    wo = stk("wo")
    bo = stk("bo")[:, None, :]
    ln1g = stk("ln1_g")[:, None, :]
    ln1b = stk("ln1_b")[:, None, :]
    w1 = stk("w1")
    b1 = stk("b1")[:, None, :]
    w2 = stk("w2")
    b2 = stk("b2")[:, None, :]
    ln2g = stk("ln2_g")[:, None, :]
    ln2b = stk("ln2_b")[:, None, :]

    logits = pl.pallas_call(
        _bert_kernel,
        out_shape=jax.ShapeDtypeStruct((B, NUM_CLASSES), jnp.float32),
    )(ids2d, tok2d, add_mask,
      params["word_emb"], pos_emb_s, params["type_emb"],
      params["emb_ln_g"][None, :], params["emb_ln_b"][None, :],
      wqkv, bqkv, wo, bo, ln1g, ln1b, w1, b1, w2, b2, ln2g, ln2b,
      params["pool_w"], params["pool_b"][None, :],
      params["cls_w"], params["cls_b"][None, :])
    return logits


# ---------------- deterministic parameter init ----------------
def init_params(key):
    H, I = HIDDEN, INTERMEDIATE
    std = 0.02

    def normal(k, shape):
        return std * jax.random.normal(k, shape, dtype=jnp.float32)

    keys = iter(jax.random.split(key, 8 + NUM_LAYERS * 8))
    params = {
        "word_emb": normal(next(keys), (VOCAB, H)),
        "pos_emb": normal(next(keys), (MAX_POS, H)),
        "type_emb": normal(next(keys), (TYPE_VOCAB, H)),
        "emb_ln_g": jnp.ones((H,), jnp.float32),
        "emb_ln_b": jnp.zeros((H,), jnp.float32),
        "pool_w": normal(next(keys), (H, H)),
        "pool_b": jnp.zeros((H,), jnp.float32),
        "cls_w": normal(next(keys), (H, NUM_CLASSES)),
        "cls_b": jnp.zeros((NUM_CLASSES,), jnp.float32),
        "layers": [],
    }
    for _ in range(NUM_LAYERS):
        layer = {
            "wq": normal(next(keys), (H, H)), "bq": jnp.zeros((H,), jnp.float32),
            "wk": normal(next(keys), (H, H)), "bk": jnp.zeros((H,), jnp.float32),
            "wv": normal(next(keys), (H, H)), "bv": jnp.zeros((H,), jnp.float32),
            "wo": normal(next(keys), (H, H)), "bo": jnp.zeros((H,), jnp.float32),
            "ln1_g": jnp.ones((H,), jnp.float32), "ln1_b": jnp.zeros((H,), jnp.float32),
            "w1": normal(next(keys), (H, I)), "b1": jnp.zeros((I,), jnp.float32),
            "w2": normal(next(keys), (I, H)), "b2": jnp.zeros((H,), jnp.float32),
            "ln2_g": jnp.ones((H,), jnp.float32), "ln2_b": jnp.zeros((H,), jnp.float32),
        }
        params["layers"].append(layer)
    return params


if __name__ == "__main__":
    key = jax.random.PRNGKey(0)
    pkey, ikey = jax.random.split(key)
    params = init_params(pkey)

    B, S = 2, 8
    input_ids = jax.random.randint(ikey, (B, S), 0, VOCAB, dtype=jnp.int32)
    attention_mask = jnp.array([[1, 1, 1, 1, 1, 1, 1, 1],
                                [1, 1, 1, 1, 1, 0, 0, 0]], dtype=jnp.int32)
    token_type_ids = jnp.zeros((B, S), dtype=jnp.int32)

    fwd = jax.jit(bert_forward)
    logits = fwd(params, input_ids, attention_mask, token_type_ids)
    logits = jax.block_until_ready(logits)
    assert logits.shape == (B, NUM_CLASSES)
    assert jnp.all(jnp.isfinite(logits))
    print("KERNEL_OK")
</pallas_src>

<mosaic_0001>
module attributes {stable_mosaic.version = 11 : i64} {
  func.func @_bert_kernel(%arg0: memref<16x1xi32, #tpu.memory_space<vmem>>, %arg1: memref<16x1xi32, #tpu.memory_space<vmem>>, %arg2: memref<16x16xf32, #tpu.memory_space<vmem>>, %arg3: memref<100x32xf32, #tpu.memory_space<vmem>>, %arg4: memref<8x32xf32, #tpu.memory_space<vmem>>, %arg5: memref<2x32xf32, #tpu.memory_space<vmem>>, %arg6: memref<1x32xf32, #tpu.memory_space<vmem>>, %arg7: memref<1x32xf32, #tpu.memory_space<vmem>>, %arg8: memref<2x32x96xf32, #tpu.memory_space<vmem>>, %arg9: memref<2x1x96xf32, #tpu.memory_space<vmem>>, %arg10: memref<2x32x32xf32, #tpu.memory_space<vmem>>, %arg11: memref<2x1x32xf32, #tpu.memory_space<vmem>>, %arg12: memref<2x1x32xf32, #tpu.memory_space<vmem>>, %arg13: memref<2x1x32xf32, #tpu.memory_space<vmem>>, %arg14: memref<2x32x64xf32, #tpu.memory_space<vmem>>, %arg15: memref<2x1x64xf32, #tpu.memory_space<vmem>>, %arg16: memref<2x64x32xf32, #tpu.memory_space<vmem>>, %arg17: memref<2x1x32xf32, #tpu.memory_space<vmem>>, %arg18: memref<2x1x32xf32, #tpu.memory_space<vmem>>, %arg19: memref<2x1x32xf32, #tpu.memory_space<vmem>>, %arg20: memref<32x32xf32, #tpu.memory_space<vmem>>, %arg21: memref<1x32xf32, #tpu.memory_space<vmem>>, %arg22: memref<32x2xf32, #tpu.memory_space<vmem>>, %arg23: memref<1x2xf32, #tpu.memory_space<vmem>>, %arg24: memref<2x2xf32, #tpu.memory_space<vmem>>) attributes {dimension_semantics = [], scalar_prefetch = 0 : i64, scratch_operands = 0 : i64, tpu.core_type = #tpu.core_type<tc>} {
    %c0 = arith.constant 0 : index
    %c0_0 = arith.constant 0 : index
    %0 = vector.load %arg0[%c0, %c0_0] : memref<16x1xi32, #tpu.memory_space<vmem>>, vector<16x1xi32>
    %1 = tpu.iota {dimensions = array<i32: 1>} : vector<16x100xi32>
    %2 = vector.broadcast %0 : vector<16x1xi32> to vector<16x100xi32>
    %3 = arith.cmpi eq, %1, %2 : vector<16x100xi32>
    %4 = arith.extui %3 : vector<16x100xi1> to vector<16x100xi32>
    %5 = arith.sitofp %4 : vector<16x100xi32> to vector<16x100xf32>
    %c0_1 = arith.constant 0 : index
    %c0_2 = arith.constant 0 : index
    %6 = vector.load %arg3[%c0_1, %c0_2] : memref<100x32xf32, #tpu.memory_space<vmem>>, vector<100x32xf32>
    %cst = arith.constant dense<0.000000e+00> : vector<16x32xf32>
    %7 = tpu.matmul %5, %6, %cst {dimension_numbers = #tpu.dot_dimension_numbers<[1], [0], [0], [1], [0, 0, 1, 1], [], []>} : vector<16x100xf32>, vector<100x32xf32>, vector<16x32xf32> -> vector<16x32xf32>
    %c0_3 = arith.constant 0 : index
    %c0_4 = arith.constant 0 : index
    %8 = vector.load %arg1[%c0_3, %c0_4] : memref<16x1xi32, #tpu.memory_space<vmem>>, vector<16x1xi32>
    %9 = tpu.iota {dimensions = array<i32: 1>} : vector<16x2xi32>
    %10 = vector.broadcast %8 : vector<16x1xi32> to vector<16x2xi32>
    %11 = arith.cmpi eq, %9, %10 : vector<16x2xi32>
    %12 = arith.extui %11 : vector<16x2xi1> to vector<16x2xi32>
    %13 = arith.sitofp %12 : vector<16x2xi32> to vector<16x2xf32>
    %c0_5 = arith.constant 0 : index
    %c0_6 = arith.constant 0 : index
    %14 = vector.load %arg5[%c0_5, %c0_6] : memref<2x32xf32, #tpu.memory_space<vmem>>, vector<2x32xf32>
    %cst_7 = arith.constant dense<0.000000e+00> : vector<16x32xf32>
    %15 = tpu.matmul %13, %14, %cst_7 {dimension_numbers = #tpu.dot_dimension_numbers<[1], [0], [0], [1], [0, 0, 1, 1], [], []>} : vector<16x2xf32>, vector<2x32xf32>, vector<16x32xf32> -> vector<16x32xf32>
    %c0_8 = arith.constant 0 : index
    %c0_9 = arith.constant 0 : index
    %16 = vector.load %arg4[%c0_8, %c0_9] : memref<8x32xf32, #tpu.memory_space<vmem>>, vector<8x32xf32>
    %17 = tpu.concatenate %16, %16 in 0 : vector<8x32xf32>, vector<8x32xf32> -> vector<16x32xf32>
    %18 = arith.addf %7, %17 : vector<16x32xf32>
    %19 = arith.addf %18, %15 : vector<16x32xf32>
    %c0_10 = arith.constant 0 : index
    %c0_11 = arith.constant 0 : index
    %20 = vector.load %arg6[%c0_10, %c0_11] : memref<1x32xf32, #tpu.memory_space<vmem>>, vector<1x32xf32>
    %c0_12 = arith.constant 0 : index
    %c0_13 = arith.constant 0 : index
    %21 = vector.load %arg7[%c0_12, %c0_13] : memref<1x32xf32, #tpu.memory_space<vmem>>, vector<1x32xf32>
    %cst_14 = arith.constant dense<0.000000e+00> : vector<16xf32>
    %22 = vector.multi_reduction <add>, %19, %cst_14 [1] : vector<16x32xf32> to vector<16xf32>
    %23 = vector.shape_cast %22 : vector<16xf32> to vector<16x1xf32>
    %cst_15 = arith.constant 3.200000e+01 : f32
    %24 = vector.broadcast %cst_15 : f32 to vector<16x1xf32>
    %25 = arith.divf %23, %24 : vector<16x1xf32>
    %26 = vector.broadcast %25 : vector<16x1xf32> to vector<16x32xf32>
    %27 = arith.subf %19, %26 : vector<16x32xf32>
    %28 = arith.mulf %27, %27 : vector<16x32xf32>
    %cst_16 = arith.constant dense<0.000000e+00> : vector<16xf32>
    %29 = vector.multi_reduction <add>, %28, %cst_16 [1] : vector<16x32xf32> to vector<16xf32>
    %30 = vector.shape_cast %29 : vector<16xf32> to vector<16x1xf32>
    %cst_17 = arith.constant 3.200000e+01 : f32
    %31 = vector.broadcast %cst_17 : f32 to vector<16x1xf32>
    %32 = arith.divf %30, %31 : vector<16x1xf32>
    %33 = vector.broadcast %25 : vector<16x1xf32> to vector<16x32xf32>
    %34 = arith.subf %19, %33 : vector<16x32xf32>
    %cst_18 = arith.constant 9.99999996E-13 : f32
    %35 = vector.broadcast %cst_18 : f32 to vector<16x1xf32>
    %36 = arith.addf %32, %35 : vector<16x1xf32>
    %37 = math.rsqrt %36 : vector<16x1xf32>
    %38 = vector.broadcast %37 : vector<16x1xf32> to vector<16x32xf32>
    %39 = arith.mulf %34, %38 : vector<16x32xf32>
    %40 = vector.broadcast %20 : vector<1x32xf32> to vector<16x32xf32>
    %41 = arith.mulf %39, %40 : vector<16x32xf32>
    %42 = vector.broadcast %21 : vector<1x32xf32> to vector<16x32xf32>
    %43 = arith.addf %41, %42 : vector<16x32xf32>
    %c0_19 = arith.constant 0 : index
    %c0_20 = arith.constant 0 : index
    %44 = vector.load %arg2[%c0_19, %c0_20] : memref<16x16xf32, #tpu.memory_space<vmem>>, vector<16x16xf32>
    %c0_21 = arith.constant 0 : index
    %c0_22 = arith.constant 0 : index
    %c0_23 = arith.constant 0 : index
    %45 = vector.load %arg8[%c0_21, %c0_22, %c0_23] : memref<2x32x96xf32, #tpu.memory_space<vmem>>, vector<1x32x96xf32>
    %46 = vector.shape_cast %45 : vector<1x32x96xf32> to vector<32x96xf32>
    %cst_24 = arith.constant dense<0.000000e+00> : vector<16x96xf32>
    %47 = tpu.matmul %43, %46, %cst_24 {dimension_numbers = #tpu.dot_dimension_numbers<[1], [0], [0], [1], [0, 0, 1, 1], [], []>} : vector<16x32xf32>, vector<32x96xf32>, vector<16x96xf32> -> vector<16x96xf32>
    %c0_25 = arith.constant 0 : index
    %c0_26 = arith.constant 0 : index
    %c0_27 = arith.constant 0 : index
    %48 = vector.load %arg9[%c0_25, %c0_26, %c0_27] : memref<2x1x96xf32, #tpu.memory_space<vmem>>, vector<1x1x96xf32>
    %49 = vector.shape_cast %48 : vector<1x1x96xf32> to vector<1x96xf32>
    %50 = vector.broadcast %49 : vector<1x96xf32> to vector<16x96xf32>
    %51 = arith.addf %47, %50 : vector<16x96xf32>
    %52 = vector.extract_strided_slice %51 {offsets = [0, 0], sizes = [16, 16], strides = [1, 1]} : vector<16x96xf32> to vector<16x16xf32>
    %53 = vector.extract_strided_slice %51 {offsets = [0, 32], sizes = [16, 16], strides = [1, 1]} : vector<16x96xf32> to vector<16x16xf32>
    %54 = vector.extract_strided_slice %51 {offsets = [0, 64], sizes = [16, 16], strides = [1, 1]} : vector<16x96xf32> to vector<16x16xf32>
    %55 = tpu.transpose %53, [1, 0] : vector<16x16xf32> -> vector<16x16xf32>
    %cst_28 = arith.constant dense<0.000000e+00> : vector<16x16xf32>
    %56 = tpu.matmul %52, %55, %cst_28 {dimension_numbers = #tpu.dot_dimension_numbers<[1], [0], [0], [1], [0, 0, 1, 1], [], []>} : vector<16x16xf32>, vector<16x16xf32>, vector<16x16xf32> -> vector<16x16xf32>
    %cst_29 = arith.constant 2.500000e-01 : f32
    %57 = vector.broadcast %cst_29 : f32 to vector<16x16xf32>
    %58 = arith.mulf %56, %57 : vector<16x16xf32>
    %59 = arith.addf %58, %44 : vector<16x16xf32>
    %cst_30 = arith.constant dense<0xFF800000> : vector<16xf32>
    %60 = vector.multi_reduction <maximumf>, %59, %cst_30 [1] : vector<16x16xf32> to vector<16xf32>
    %61 = vector.shape_cast %60 : vector<16xf32> to vector<16x1xf32>
    %62 = vector.broadcast %61 : vector<16x1xf32> to vector<16x16xf32>
    %63 = arith.subf %59, %62 : vector<16x16xf32>
    %64 = math.exp %63 : vector<16x16xf32>
    %cst_31 = arith.constant dense<0.000000e+00> : vector<16xf32>
    %65 = vector.multi_reduction <add>, %64, %cst_31 [1] : vector<16x16xf32> to vector<16xf32>
    %66 = vector.shape_cast %65 : vector<16xf32> to vector<16x1xf32>
    %67 = tpu.reciprocal %66 {approx = true} : vector<16x1xf32> -> vector<16x1xf32>
    %68 = vector.broadcast %67 : vector<16x1xf32> to vector<16x16xf32>
    %69 = arith.mulf %64, %68 : vector<16x16xf32>
    %cst_32 = arith.constant dense<0.000000e+00> : vector<16x16xf32>
    %70 = tpu.matmul %69, %54, %cst_32 {dimension_numbers = #tpu.dot_dimension_numbers<[1], [0], [0], [1], [0, 0, 1, 1], [], []>} : vector<16x16xf32>, vector<16x16xf32>, vector<16x16xf32> -> vector<16x16xf32>
    %71 = vector.extract_strided_slice %51 {offsets = [0, 16], sizes = [16, 16], strides = [1, 1]} : vector<16x96xf32> to vector<16x16xf32>
    %72 = vector.extract_strided_slice %51 {offsets = [0, 48], sizes = [16, 16], strides = [1, 1]} : vector<16x96xf32> to vector<16x16xf32>
    %73 = vector.extract_strided_slice %51 {offsets = [0, 80], sizes = [16, 16], strides = [1, 1]} : vector<16x96xf32> to vector<16x16xf32>
    %74 = tpu.transpose %72, [1, 0] : vector<16x16xf32> -> vector<16x16xf32>
    %cst_33 = arith.constant dense<0.000000e+00> : vector<16x16xf32>
    %75 = tpu.matmul %71, %74, %cst_33 {dimension_numbers = #tpu.dot_dimension_numbers<[1], [0], [0], [1], [0, 0, 1, 1], [], []>} : vector<16x16xf32>, vector<16x16xf32>, vector<16x16xf32> -> vector<16x16xf32>
    %cst_34 = arith.constant 2.500000e-01 : f32
    %76 = vector.broadcast %cst_34 : f32 to vector<16x16xf32>
    %77 = arith.mulf %75, %76 : vector<16x16xf32>
    %78 = arith.addf %77, %44 : vector<16x16xf32>
    %cst_35 = arith.constant dense<0xFF800000> : vector<16xf32>
    %79 = vector.multi_reduction <maximumf>, %78, %cst_35 [1] : vector<16x16xf32> to vector<16xf32>
    %80 = vector.shape_cast %79 : vector<16xf32> to vector<16x1xf32>
    %81 = vector.broadcast %80 : vector<16x1xf32> to vector<16x16xf32>
    %82 = arith.subf %78, %81 : vector<16x16xf32>
    %83 = math.exp %82 : vector<16x16xf32>
    %cst_36 = arith.constant dense<0.000000e+00> : vector<16xf32>
    %84 = vector.multi_reduction <add>, %83, %cst_36 [1] : vector<16x16xf32> to vector<16xf32>
    %85 = vector.shape_cast %84 : vector<16xf32> to vector<16x1xf32>
    %86 = tpu.reciprocal %85 {approx = true} : vector<16x1xf32> -> vector<16x1xf32>
    %87 = vector.broadcast %86 : vector<16x1xf32> to vector<16x16xf32>
    %88 = arith.mulf %83, %87 : vector<16x16xf32>
    %cst_37 = arith.constant dense<0.000000e+00> : vector<16x16xf32>
    %89 = tpu.matmul %88, %73, %cst_37 {dimension_numbers = #tpu.dot_dimension_numbers<[1], [0], [0], [1], [0, 0, 1, 1], [], []>} : vector<16x16xf32>, vector<16x16xf32>, vector<16x16xf32> -> vector<16x16xf32>
    %90 = tpu.concatenate %70, %89 in 1 : vector<16x16xf32>, vector<16x16xf32> -> vector<16x32xf32>
    %c0_38 = arith.constant 0 : index
    %c0_39 = arith.constant 0 : index
    %c0_40 = arith.constant 0 : index
    %91 = vector.load %arg10[%c0_38, %c0_39, %c0_40] : memref<2x32x32xf32, #tpu.memory_space<vmem>>, vector<1x32x32xf32>
    %92 = vector.shape_cast %91 : vector<1x32x32xf32> to vector<32x32xf32>
    %cst_41 = arith.constant dense<0.000000e+00> : vector<16x32xf32>
    %93 = tpu.matmul %90, %92, %cst_41 {dimension_numbers = #tpu.dot_dimension_numbers<[1], [0], [0], [1], [0, 0, 1, 1], [], []>} : vector<16x32xf32>, vector<32x32xf32>, vector<16x32xf32> -> vector<16x32xf32>
    %c0_42 = arith.constant 0 : index
    %c0_43 = arith.constant 0 : index
    %c0_44 = arith.constant 0 : index
    %94 = vector.load %arg11[%c0_42, %c0_43, %c0_44] : memref<2x1x32xf32, #tpu.memory_space<vmem>>, vector<1x1x32xf32>
    %95 = vector.shape_cast %94 : vector<1x1x32xf32> to vector<1x32xf32>
    %96 = vector.broadcast %95 : vector<1x32xf32> to vector<16x32xf32>
    %97 = arith.addf %93, %96 : vector<16x32xf32>
    %98 = arith.addf %97, %43 : vector<16x32xf32>
    %c0_45 = arith.constant 0 : index
    %c0_46 = arith.constant 0 : index
    %c0_47 = arith.constant 0 : index
    %99 = vector.load %arg12[%c0_45, %c0_46, %c0_47] : memref<2x1x32xf32, #tpu.memory_space<vmem>>, vector<1x1x32xf32>
    %100 = vector.shape_cast %99 : vector<1x1x32xf32> to vector<1x32xf32>
    %c0_48 = arith.constant 0 : index
    %c0_49 = arith.constant 0 : index
    %c0_50 = arith.constant 0 : index
    %101 = vector.load %arg13[%c0_48, %c0_49, %c0_50] : memref<2x1x32xf32, #tpu.memory_space<vmem>>, vector<1x1x32xf32>
    %102 = vector.shape_cast %101 : vector<1x1x32xf32> to vector<1x32xf32>
    %cst_51 = arith.constant dense<0.000000e+00> : vector<16xf32>
    %103 = vector.multi_reduction <add>, %98, %cst_51 [1] : vector<16x32xf32> to vector<16xf32>
    %104 = vector.shape_cast %103 : vector<16xf32> to vector<16x1xf32>
    %cst_52 = arith.constant 3.200000e+01 : f32
    %105 = vector.broadcast %cst_52 : f32 to vector<16x1xf32>
    %106 = arith.divf %104, %105 : vector<16x1xf32>
    %107 = vector.broadcast %106 : vector<16x1xf32> to vector<16x32xf32>
    %108 = arith.subf %98, %107 : vector<16x32xf32>
    %109 = arith.mulf %108, %108 : vector<16x32xf32>
    %cst_53 = arith.constant dense<0.000000e+00> : vector<16xf32>
    %110 = vector.multi_reduction <add>, %109, %cst_53 [1] : vector<16x32xf32> to vector<16xf32>
    %111 = vector.shape_cast %110 : vector<16xf32> to vector<16x1xf32>
    %cst_54 = arith.constant 3.200000e+01 : f32
    %112 = vector.broadcast %cst_54 : f32 to vector<16x1xf32>
    %113 = arith.divf %111, %112 : vector<16x1xf32>
    %114 = vector.broadcast %106 : vector<16x1xf32> to vector<16x32xf32>
    %115 = arith.subf %98, %114 : vector<16x32xf32>
    %cst_55 = arith.constant 9.99999996E-13 : f32
    %116 = vector.broadcast %cst_55 : f32 to vector<16x1xf32>
    %117 = arith.addf %113, %116 : vector<16x1xf32>
    %118 = math.rsqrt %117 : vector<16x1xf32>
    %119 = vector.broadcast %118 : vector<16x1xf32> to vector<16x32xf32>
    %120 = arith.mulf %115, %119 : vector<16x32xf32>
    %121 = vector.broadcast %100 : vector<1x32xf32> to vector<16x32xf32>
    %122 = arith.mulf %120, %121 : vector<16x32xf32>
    %123 = vector.broadcast %102 : vector<1x32xf32> to vector<16x32xf32>
    %124 = arith.addf %122, %123 : vector<16x32xf32>
    %c0_56 = arith.constant 0 : index
    %c0_57 = arith.constant 0 : index
    %c0_58 = arith.constant 0 : index
    %125 = vector.load %arg14[%c0_56, %c0_57, %c0_58] : memref<2x32x64xf32, #tpu.memory_space<vmem>>, vector<1x32x64xf32>
    %126 = vector.shape_cast %125 : vector<1x32x64xf32> to vector<32x64xf32>
    %cst_59 = arith.constant dense<0.000000e+00> : vector<16x64xf32>
    %127 = tpu.matmul %124, %126, %cst_59 {dimension_numbers = #tpu.dot_dimension_numbers<[1], [0], [0], [1], [0, 0, 1, 1], [], []>} : vector<16x32xf32>, vector<32x64xf32>, vector<16x64xf32> -> vector<16x64xf32>
    %c0_60 = arith.constant 0 : index
    %c0_61 = arith.constant 0 : index
    %c0_62 = arith.constant 0 : index
    %128 = vector.load %arg15[%c0_60, %c0_61, %c0_62] : memref<2x1x64xf32, #tpu.memory_space<vmem>>, vector<1x1x64xf32>
    %129 = vector.shape_cast %128 : vector<1x1x64xf32> to vector<1x64xf32>
    %130 = vector.broadcast %129 : vector<1x64xf32> to vector<16x64xf32>
    %131 = arith.addf %127, %130 : vector<16x64xf32>
    %cst_63 = arith.constant 5.000000e-01 : f32
    %132 = vector.broadcast %cst_63 : f32 to vector<16x64xf32>
    %133 = arith.mulf %132, %131 : vector<16x64xf32>
    %cst_64 = arith.constant 0.707106769 : f32
    %134 = vector.broadcast %cst_64 : f32 to vector<16x64xf32>
    %135 = arith.mulf %131, %134 : vector<16x64xf32>
    %136 = math.erf %135 : vector<16x64xf32>
    %cst_65 = arith.constant 1.000000e+00 : f32
    %137 = vector.broadcast %cst_65 : f32 to vector<16x64xf32>
    %138 = arith.addf %137, %136 : vector<16x64xf32>
    %139 = arith.mulf %133, %138 : vector<16x64xf32>
    %c0_66 = arith.constant 0 : index
    %c0_67 = arith.constant 0 : index
    %c0_68 = arith.constant 0 : index
    %140 = vector.load %arg16[%c0_66, %c0_67, %c0_68] : memref<2x64x32xf32, #tpu.memory_space<vmem>>, vector<1x64x32xf32>
    %141 = vector.shape_cast %140 : vector<1x64x32xf32> to vector<64x32xf32>
    %cst_69 = arith.constant dense<0.000000e+00> : vector<16x32xf32>
    %142 = tpu.matmul %139, %141, %cst_69 {dimension_numbers = #tpu.dot_dimension_numbers<[1], [0], [0], [1], [0, 0, 1, 1], [], []>} : vector<16x64xf32>, vector<64x32xf32>, vector<16x32xf32> -> vector<16x32xf32>
    %c0_70 = arith.constant 0 : index
    %c0_71 = arith.constant 0 : index
    %c0_72 = arith.constant 0 : index
    %143 = vector.load %arg17[%c0_70, %c0_71, %c0_72] : memref<2x1x32xf32, #tpu.memory_space<vmem>>, vector<1x1x32xf32>
    %144 = vector.shape_cast %143 : vector<1x1x32xf32> to vector<1x32xf32>
    %145 = vector.broadcast %144 : vector<1x32xf32> to vector<16x32xf32>
    %146 = arith.addf %142, %145 : vector<16x32xf32>
    %147 = arith.addf %146, %124 : vector<16x32xf32>
    %c0_73 = arith.constant 0 : index
    %c0_74 = arith.constant 0 : index
    %c0_75 = arith.constant 0 : index
    %148 = vector.load %arg18[%c0_73, %c0_74, %c0_75] : memref<2x1x32xf32, #tpu.memory_space<vmem>>, vector<1x1x32xf32>
    %149 = vector.shape_cast %148 : vector<1x1x32xf32> to vector<1x32xf32>
    %c0_76 = arith.constant 0 : index
    %c0_77 = arith.constant 0 : index
    %c0_78 = arith.constant 0 : index
    %150 = vector.load %arg19[%c0_76, %c0_77, %c0_78] : memref<2x1x32xf32, #tpu.memory_space<vmem>>, vector<1x1x32xf32>
    %151 = vector.shape_cast %150 : vector<1x1x32xf32> to vector<1x32xf32>
    %cst_79 = arith.constant dense<0.000000e+00> : vector<16xf32>
    %152 = vector.multi_reduction <add>, %147, %cst_79 [1] : vector<16x32xf32> to vector<16xf32>
    %153 = vector.shape_cast %152 : vector<16xf32> to vector<16x1xf32>
    %cst_80 = arith.constant 3.200000e+01 : f32
    %154 = vector.broadcast %cst_80 : f32 to vector<16x1xf32>
    %155 = arith.divf %153, %154 : vector<16x1xf32>
    %156 = vector.broadcast %155 : vector<16x1xf32> to vector<16x32xf32>
    %157 = arith.subf %147, %156 : vector<16x32xf32>
    %158 = arith.mulf %157, %157 : vector<16x32xf32>
    %cst_81 = arith.constant dense<0.000000e+00> : vector<16xf32>
    %159 = vector.multi_reduction <add>, %158, %cst_81 [1] : vector<16x32xf32> to vector<16xf32>
    %160 = vector.shape_cast %159 : vector<16xf32> to vector<16x1xf32>
    %cst_82 = arith.constant 3.200000e+01 : f32
    %161 = vector.broadcast %cst_82 : f32 to vector<16x1xf32>
    %162 = arith.divf %160, %161 : vector<16x1xf32>
    %163 = vector.broadcast %155 : vector<16x1xf32> to vector<16x32xf32>
    %164 = arith.subf %147, %163 : vector<16x32xf32>
    %cst_83 = arith.constant 9.99999996E-13 : f32
    %165 = vector.broadcast %cst_83 : f32 to vector<16x1xf32>
    %166 = arith.addf %162, %165 : vector<16x1xf32>
    %167 = math.rsqrt %166 : vector<16x1xf32>
    %168 = vector.broadcast %167 : vector<16x1xf32> to vector<16x32xf32>
    %169 = arith.mulf %164, %168 : vector<16x32xf32>
    %170 = vector.broadcast %149 : vector<1x32xf32> to vector<16x32xf32>
    %171 = arith.mulf %169, %170 : vector<16x32xf32>
    %172 = vector.broadcast %151 : vector<1x32xf32> to vector<16x32xf32>
    %173 = arith.addf %171, %172 : vector<16x32xf32>
    %c1 = arith.constant 1 : index
    %c0_84 = arith.constant 0 : index
    %c0_85 = arith.constant 0 : index
    %174 = vector.load %arg8[%c1, %c0_84, %c0_85] : memref<2x32x96xf32, #tpu.memory_space<vmem>>, vector<1x32x96xf32>
    %175 = vector.shape_cast %174 : vector<1x32x96xf32> to vector<32x96xf32>
    %cst_86 = arith.constant dense<0.000000e+00> : vector<16x96xf32>
    %176 = tpu.matmul %173, %175, %cst_86 {dimension_numbers = #tpu.dot_dimension_numbers<[1], [0], [0], [1], [0, 0, 1, 1], [], []>} : vector<16x32xf32>, vector<32x96xf32>, vector<16x96xf32> -> vector<16x96xf32>
    %c1_87 = arith.constant 1 : index
    %c0_88 = arith.constant 0 : index
    %c0_89 = arith.constant 0 : index
    %177 = vector.load %arg9[%c1_87, %c0_88, %c0_89] : memref<2x1x96xf32, #tpu.memory_space<vmem>>, vector<1x1x96xf32>
    %178 = vector.shape_cast %177 : vector<1x1x96xf32> to vector<1x96xf32>
    %179 = vector.broadcast %178 : vector<1x96xf32> to vector<16x96xf32>
    %180 = arith.addf %176, %179 : vector<16x96xf32>
    %181 = vector.extract_strided_slice %180 {offsets = [0, 0], sizes = [16, 16], strides = [1, 1]} : vector<16x96xf32> to vector<16x16xf32>
    %182 = vector.extract_strided_slice %180 {offsets = [0, 32], sizes = [16, 16], strides = [1, 1]} : vector<16x96xf32> to vector<16x16xf32>
    %183 = vector.extract_strided_slice %180 {offsets = [0, 64], sizes = [16, 16], strides = [1, 1]} : vector<16x96xf32> to vector<16x16xf32>
    %184 = tpu.transpose %182, [1, 0] : vector<16x16xf32> -> vector<16x16xf32>
    %cst_90 = arith.constant dense<0.000000e+00> : vector<16x16xf32>
    %185 = tpu.matmul %181, %184, %cst_90 {dimension_numbers = #tpu.dot_dimension_numbers<[1], [0], [0], [1], [0, 0, 1, 1], [], []>} : vector<16x16xf32>, vector<16x16xf32>, vector<16x16xf32> -> vector<16x16xf32>
    %cst_91 = arith.constant 2.500000e-01 : f32
    %186 = vector.broadcast %cst_91 : f32 to vector<16x16xf32>
    %187 = arith.mulf %185, %186 : vector<16x16xf32>
    %188 = arith.addf %187, %44 : vector<16x16xf32>
    %cst_92 = arith.constant dense<0xFF800000> : vector<16xf32>
    %189 = vector.multi_reduction <maximumf>, %188, %cst_92 [1] : vector<16x16xf32> to vector<16xf32>
    %190 = vector.shape_cast %189 : vector<16xf32> to vector<16x1xf32>
    %191 = vector.broadcast %190 : vector<16x1xf32> to vector<16x16xf32>
    %192 = arith.subf %188, %191 : vector<16x16xf32>
    %193 = math.exp %192 : vector<16x16xf32>
    %cst_93 = arith.constant dense<0.000000e+00> : vector<16xf32>
    %194 = vector.multi_reduction <add>, %193, %cst_93 [1] : vector<16x16xf32> to vector<16xf32>
    %195 = vector.shape_cast %194 : vector<16xf32> to vector<16x1xf32>
    %196 = tpu.reciprocal %195 {approx = true} : vector<16x1xf32> -> vector<16x1xf32>
    %197 = vector.broadcast %196 : vector<16x1xf32> to vector<16x16xf32>
    %198 = arith.mulf %193, %197 : vector<16x16xf32>
    %cst_94 = arith.constant dense<0.000000e+00> : vector<16x16xf32>
    %199 = tpu.matmul %198, %183, %cst_94 {dimension_numbers = #tpu.dot_dimension_numbers<[1], [0], [0], [1], [0, 0, 1, 1], [], []>} : vector<16x16xf32>, vector<16x16xf32>, vector<16x16xf32> -> vector<16x16xf32>
    %200 = vector.extract_strided_slice %180 {offsets = [0, 16], sizes = [16, 16], strides = [1, 1]} : vector<16x96xf32> to vector<16x16xf32>
    %201 = vector.extract_strided_slice %180 {offsets = [0, 48], sizes = [16, 16], strides = [1, 1]} : vector<16x96xf32> to vector<16x16xf32>
    %202 = vector.extract_strided_slice %180 {offsets = [0, 80], sizes = [16, 16], strides = [1, 1]} : vector<16x96xf32> to vector<16x16xf32>
    %203 = tpu.transpose %201, [1, 0] : vector<16x16xf32> -> vector<16x16xf32>
    %cst_95 = arith.constant dense<0.000000e+00> : vector<16x16xf32>
    %204 = tpu.matmul %200, %203, %cst_95 {dimension_numbers = #tpu.dot_dimension_numbers<[1], [0], [0], [1], [0, 0, 1, 1], [], []>} : vector<16x16xf32>, vector<16x16xf32>, vector<16x16xf32> -> vector<16x16xf32>
    %cst_96 = arith.constant 2.500000e-01 : f32
    %205 = vector.broadcast %cst_96 : f32 to vector<16x16xf32>
    %206 = arith.mulf %204, %205 : vector<16x16xf32>
    %207 = arith.addf %206, %44 : vector<16x16xf32>
    %cst_97 = arith.constant dense<0xFF800000> : vector<16xf32>
    %208 = vector.multi_reduction <maximumf>, %207, %cst_97 [1] : vector<16x16xf32> to vector<16xf32>
    %209 = vector.shape_cast %208 : vector<16xf32> to vector<16x1xf32>
    %210 = vector.broadcast %209 : vector<16x1xf32> to vector<16x16xf32>
    %211 = arith.subf %207, %210 : vector<16x16xf32>
    %212 = math.exp %211 : vector<16x16xf32>
    %cst_98 = arith.constant dense<0.000000e+00> : vector<16xf32>
    %213 = vector.multi_reduction <add>, %212, %cst_98 [1] : vector<16x16xf32> to vector<16xf32>
    %214 = vector.shape_cast %213 : vector<16xf32> to vector<16x1xf32>
    %215 = tpu.reciprocal %214 {approx = true} : vector<16x1xf32> -> vector<16x1xf32>
    %216 = vector.broadcast %215 : vector<16x1xf32> to vector<16x16xf32>
    %217 = arith.mulf %212, %216 : vector<16x16xf32>
    %cst_99 = arith.constant dense<0.000000e+00> : vector<16x16xf32>
    %218 = tpu.matmul %217, %202, %cst_99 {dimension_numbers = #tpu.dot_dimension_numbers<[1], [0], [0], [1], [0, 0, 1, 1], [], []>} : vector<16x16xf32>, vector<16x16xf32>, vector<16x16xf32> -> vector<16x16xf32>
    %219 = tpu.concatenate %199, %218 in 1 : vector<16x16xf32>, vector<16x16xf32> -> vector<16x32xf32>
    %c1_100 = arith.constant 1 : index
    %c0_101 = arith.constant 0 : index
    %c0_102 = arith.constant 0 : index
    %220 = vector.load %arg10[%c1_100, %c0_101, %c0_102] : memref<2x32x32xf32, #tpu.memory_space<vmem>>, vector<1x32x32xf32>
    %221 = vector.shape_cast %220 : vector<1x32x32xf32> to vector<32x32xf32>
    %cst_103 = arith.constant dense<0.000000e+00> : vector<16x32xf32>
    %222 = tpu.matmul %219, %221, %cst_103 {dimension_numbers = #tpu.dot_dimension_numbers<[1], [0], [0], [1], [0, 0, 1, 1], [], []>} : vector<16x32xf32>, vector<32x32xf32>, vector<16x32xf32> -> vector<16x32xf32>
    %c1_104 = arith.constant 1 : index
    %c0_105 = arith.constant 0 : index
    %c0_106 = arith.constant 0 : index
    %223 = vector.load %arg11[%c1_104, %c0_105, %c0_106] : memref<2x1x32xf32, #tpu.memory_space<vmem>>, vector<1x1x32xf32>
    %224 = vector.shape_cast %223 : vector<1x1x32xf32> to vector<1x32xf32>
    %225 = vector.broadcast %224 : vector<1x32xf32> to vector<16x32xf32>
    %226 = arith.addf %222, %225 : vector<16x32xf32>
    %227 = arith.addf %226, %173 : vector<16x32xf32>
    %c1_107 = arith.constant 1 : index
    %c0_108 = arith.constant 0 : index
    %c0_109 = arith.constant 0 : index
    %228 = vector.load %arg12[%c1_107, %c0_108, %c0_109] : memref<2x1x32xf32, #tpu.memory_space<vmem>>, vector<1x1x32xf32>
    %229 = vector.shape_cast %228 : vector<1x1x32xf32> to vector<1x32xf32>
    %c1_110 = arith.constant 1 : index
    %c0_111 = arith.constant 0 : index
    %c0_112 = arith.constant 0 : index
    %230 = vector.load %arg13[%c1_110, %c0_111, %c0_112] : memref<2x1x32xf32, #tpu.memory_space<vmem>>, vector<1x1x32xf32>
    %231 = vector.shape_cast %230 : vector<1x1x32xf32> to vector<1x32xf32>
    %cst_113 = arith.constant dense<0.000000e+00> : vector<16xf32>
    %232 = vector.multi_reduction <add>, %227, %cst_113 [1] : vector<16x32xf32> to vector<16xf32>
    %233 = vector.shape_cast %232 : vector<16xf32> to vector<16x1xf32>
    %cst_114 = arith.constant 3.200000e+01 : f32
    %234 = vector.broadcast %cst_114 : f32 to vector<16x1xf32>
    %235 = arith.divf %233, %234 : vector<16x1xf32>
    %236 = vector.broadcast %235 : vector<16x1xf32> to vector<16x32xf32>
    %237 = arith.subf %227, %236 : vector<16x32xf32>
    %238 = arith.mulf %237, %237 : vector<16x32xf32>
    %cst_115 = arith.constant dense<0.000000e+00> : vector<16xf32>
    %239 = vector.multi_reduction <add>, %238, %cst_115 [1] : vector<16x32xf32> to vector<16xf32>
    %240 = vector.shape_cast %239 : vector<16xf32> to vector<16x1xf32>
    %cst_116 = arith.constant 3.200000e+01 : f32
    %241 = vector.broadcast %cst_116 : f32 to vector<16x1xf32>
    %242 = arith.divf %240, %241 : vector<16x1xf32>
    %243 = vector.broadcast %235 : vector<16x1xf32> to vector<16x32xf32>
    %244 = arith.subf %227, %243 : vector<16x32xf32>
    %cst_117 = arith.constant 9.99999996E-13 : f32
    %245 = vector.broadcast %cst_117 : f32 to vector<16x1xf32>
    %246 = arith.addf %242, %245 : vector<16x1xf32>
    %247 = math.rsqrt %246 : vector<16x1xf32>
    %248 = vector.broadcast %247 : vector<16x1xf32> to vector<16x32xf32>
    %249 = arith.mulf %244, %248 : vector<16x32xf32>
    %250 = vector.broadcast %229 : vector<1x32xf32> to vector<16x32xf32>
    %251 = arith.mulf %249, %250 : vector<16x32xf32>
    %252 = vector.broadcast %231 : vector<1x32xf32> to vector<16x32xf32>
    %253 = arith.addf %251, %252 : vector<16x32xf32>
    %c1_118 = arith.constant 1 : index
    %c0_119 = arith.constant 0 : index
    %c0_120 = arith.constant 0 : index
    %254 = vector.load %arg14[%c1_118, %c0_119, %c0_120] : memref<2x32x64xf32, #tpu.memory_space<vmem>>, vector<1x32x64xf32>
    %255 = vector.shape_cast %254 : vector<1x32x64xf32> to vector<32x64xf32>
    %cst_121 = arith.constant dense<0.000000e+00> : vector<16x64xf32>
    %256 = tpu.matmul %253, %255, %cst_121 {dimension_numbers = #tpu.dot_dimension_numbers<[1], [0], [0], [1], [0, 0, 1, 1], [], []>} : vector<16x32xf32>, vector<32x64xf32>, vector<16x64xf32> -> vector<16x64xf32>
    %c1_122 = arith.constant 1 : index
    %c0_123 = arith.constant 0 : index
    %c0_124 = arith.constant 0 : index
    %257 = vector.load %arg15[%c1_122, %c0_123, %c0_124] : memref<2x1x64xf32, #tpu.memory_space<vmem>>, vector<1x1x64xf32>
    %258 = vector.shape_cast %257 : vector<1x1x64xf32> to vector<1x64xf32>
    %259 = vector.broadcast %258 : vector<1x64xf32> to vector<16x64xf32>
    %260 = arith.addf %256, %259 : vector<16x64xf32>
    %cst_125 = arith.constant 5.000000e-01 : f32
    %261 = vector.broadcast %cst_125 : f32 to vector<16x64xf32>
    %262 = arith.mulf %261, %260 : vector<16x64xf32>
    %cst_126 = arith.constant 0.707106769 : f32
    %263 = vector.broadcast %cst_126 : f32 to vector<16x64xf32>
    %264 = arith.mulf %260, %263 : vector<16x64xf32>
    %265 = math.erf %264 : vector<16x64xf32>
    %cst_127 = arith.constant 1.000000e+00 : f32
    %266 = vector.broadcast %cst_127 : f32 to vector<16x64xf32>
    %267 = arith.addf %266, %265 : vector<16x64xf32>
    %268 = arith.mulf %262, %267 : vector<16x64xf32>
    %c1_128 = arith.constant 1 : index
    %c0_129 = arith.constant 0 : index
    %c0_130 = arith.constant 0 : index
    %269 = vector.load %arg16[%c1_128, %c0_129, %c0_130] : memref<2x64x32xf32, #tpu.memory_space<vmem>>, vector<1x64x32xf32>
    %270 = vector.shape_cast %269 : vector<1x64x32xf32> to vector<64x32xf32>
    %cst_131 = arith.constant dense<0.000000e+00> : vector<16x32xf32>
    %271 = tpu.matmul %268, %270, %cst_131 {dimension_numbers = #tpu.dot_dimension_numbers<[1], [0], [0], [1], [0, 0, 1, 1], [], []>} : vector<16x64xf32>, vector<64x32xf32>, vector<16x32xf32> -> vector<16x32xf32>
    %c1_132 = arith.constant 1 : index
    %c0_133 = arith.constant 0 : index
    %c0_134 = arith.constant 0 : index
    %272 = vector.load %arg17[%c1_132, %c0_133, %c0_134] : memref<2x1x32xf32, #tpu.memory_space<vmem>>, vector<1x1x32xf32>
    %273 = vector.shape_cast %272 : vector<1x1x32xf32> to vector<1x32xf32>
    %274 = vector.broadcast %273 : vector<1x32xf32> to vector<16x32xf32>
    %275 = arith.addf %271, %274 : vector<16x32xf32>
    %276 = arith.addf %275, %253 : vector<16x32xf32>
    %c1_135 = arith.constant 1 : index
    %c0_136 = arith.constant 0 : index
    %c0_137 = arith.constant 0 : index
    %277 = vector.load %arg18[%c1_135, %c0_136, %c0_137] : memref<2x1x32xf32, #tpu.memory_space<vmem>>, vector<1x1x32xf32>
    %278 = vector.shape_cast %277 : vector<1x1x32xf32> to vector<1x32xf32>
    %c1_138 = arith.constant 1 : index
    %c0_139 = arith.constant 0 : index
    %c0_140 = arith.constant 0 : index
    %279 = vector.load %arg19[%c1_138, %c0_139, %c0_140] : memref<2x1x32xf32, #tpu.memory_space<vmem>>, vector<1x1x32xf32>
    %280 = vector.shape_cast %279 : vector<1x1x32xf32> to vector<1x32xf32>
    %cst_141 = arith.constant dense<0.000000e+00> : vector<16xf32>
    %281 = vector.multi_reduction <add>, %276, %cst_141 [1] : vector<16x32xf32> to vector<16xf32>
    %282 = vector.shape_cast %281 : vector<16xf32> to vector<16x1xf32>
    %cst_142 = arith.constant 3.200000e+01 : f32
    %283 = vector.broadcast %cst_142 : f32 to vector<16x1xf32>
    %284 = arith.divf %282, %283 : vector<16x1xf32>
    %285 = vector.broadcast %284 : vector<16x1xf32> to vector<16x32xf32>
    %286 = arith.subf %276, %285 : vector<16x32xf32>
    %287 = arith.mulf %286, %286 : vector<16x32xf32>
    %cst_143 = arith.constant dense<0.000000e+00> : vector<16xf32>
    %288 = vector.multi_reduction <add>, %287, %cst_143 [1] : vector<16x32xf32> to vector<16xf32>
    %289 = vector.shape_cast %288 : vector<16xf32> to vector<16x1xf32>
    %cst_144 = arith.constant 3.200000e+01 : f32
    %290 = vector.broadcast %cst_144 : f32 to vector<16x1xf32>
    %291 = arith.divf %289, %290 : vector<16x1xf32>
    %292 = vector.broadcast %284 : vector<16x1xf32> to vector<16x32xf32>
    %293 = arith.subf %276, %292 : vector<16x32xf32>
    %cst_145 = arith.constant 9.99999996E-13 : f32
    %294 = vector.broadcast %cst_145 : f32 to vector<16x1xf32>
    %295 = arith.addf %291, %294 : vector<16x1xf32>
    %296 = math.rsqrt %295 : vector<16x1xf32>
    %297 = vector.broadcast %296 : vector<16x1xf32> to vector<16x32xf32>
    %298 = arith.mulf %293, %297 : vector<16x32xf32>
    %299 = vector.broadcast %278 : vector<1x32xf32> to vector<16x32xf32>
    %300 = arith.mulf %298, %299 : vector<16x32xf32>
    %301 = vector.broadcast %280 : vector<1x32xf32> to vector<16x32xf32>
    %302 = arith.addf %300, %301 : vector<16x32xf32>
    %303 = vector.extract_strided_slice %302 {offsets = [0, 0], sizes = [1, 32], strides = [1, 1]} : vector<16x32xf32> to vector<1x32xf32>
    %304 = vector.extract_strided_slice %302 {offsets = [8, 0], sizes = [1, 32], strides = [1, 1]} : vector<16x32xf32> to vector<1x32xf32>
    %305 = tpu.concatenate %303, %304 in 0 : vector<1x32xf32>, vector<1x32xf32> -> vector<2x32xf32>
    %c0_146 = arith.constant 0 : index
    %c0_147 = arith.constant 0 : index
    %306 = vector.load %arg20[%c0_146, %c0_147] : memref<32x32xf32, #tpu.memory_space<vmem>>, vector<32x32xf32>
    %cst_148 = arith.constant dense<0.000000e+00> : vector<2x32xf32>
    %307 = tpu.matmul %305, %306, %cst_148 {dimension_numbers = #tpu.dot_dimension_numbers<[1], [0], [0], [1], [0, 0, 1, 1], [], []>} : vector<2x32xf32>, vector<32x32xf32>, vector<2x32xf32> -> vector<2x32xf32>
    %c0_149 = arith.constant 0 : index
    %c0_150 = arith.constant 0 : index
    %308 = vector.load %arg21[%c0_149, %c0_150] : memref<1x32xf32, #tpu.memory_space<vmem>>, vector<1x32xf32>
    %309 = vector.broadcast %308 : vector<1x32xf32> to vector<2x32xf32>
    %310 = arith.addf %307, %309 : vector<2x32xf32>
    %311 = math.tanh %310 : vector<2x32xf32>
    %c0_151 = arith.constant 0 : index
    %c0_152 = arith.constant 0 : index
    %312 = vector.load %arg22[%c0_151, %c0_152] : memref<32x2xf32, #tpu.memory_space<vmem>>, vector<32x2xf32>
    %cst_153 = arith.constant dense<0.000000e+00> : vector<2x2xf32>
    %313 = tpu.matmul %311, %312, %cst_153 {dimension_numbers = #tpu.dot_dimension_numbers<[1], [0], [0], [1], [0, 0, 1, 1], [], []>} : vector<2x32xf32>, vector<32x2xf32>, vector<2x2xf32> -> vector<2x2xf32>
    %c0_154 = arith.constant 0 : index
    %c0_155 = arith.constant 0 : index
    %314 = vector.load %arg23[%c0_154, %c0_155] : memref<1x2xf32, #tpu.memory_space<vmem>>, vector<1x2xf32>
    %315 = vector.broadcast %314 : vector<1x2xf32> to vector<2x2xf32>
    %316 = arith.addf %313, %315 : vector<2x2xf32>
    %c0_156 = arith.constant 0 : index
    %c0_157 = arith.constant 0 : index
    %317 = vector.load %arg24[%c0_156, %c0_157] : memref<2x2xf32, #tpu.memory_space<vmem>>, vector<2x2xf32>
    tpu.vector_store %arg24[%c0_156, %c0_157], %316 {strides = array<i32>} : memref<2x2xf32, #tpu.memory_space<vmem>>, vector<2x2xf32>,
    return
  }
}

</mosaic_0001>

<bundles_post_ra>
// kernel: eq.8
= control target key start
LH: loop header
LB: loop body
LE: loop exit
PB: predicated region body
PF: predicated region fallthrough
CT: control target
= control target key end

     0   :  { %vm7_vm0 = vcmask 64512   ;;  %vm13_vm1 = vcmask 130112   ;;  %s39_s0 = inlined_call_operand.vmem [shape: s32[2,8], index: 0, kind: input, shape index: {}]   ;;  %s40_s1 = inlined_call_operand.vmem [shape: s32[16], index: 1, kind: output, shape index: {}]  }
   0x1   :  { %v4_v0 = vld [vmem:[%s39_s0] sm:$0x3]  ;;  %s22_s0 = smov 8  }
   0x2   :  { %5 = vst [vmem:[#allocation1] sm:$0x3] %v4_v0 }
   0x9   :  { %v10_v1 = vld [vmem:[#allocation1 + $0x1] sm:$0x1]   ;;  %v6_v2 = vld [vmem:[#allocation1] sm:$0x1]  }
   0xa   :  { %11 = vrot.lane.b32.xlu0 %v10_v1, %s22_s0  ;;  %8 = vst.msk [vmem:[#allocation0] sm:$0x1] %vm7_vm0, %v6_v2  }
  0x7c   :  { %v12_v3 = vpop.permute.xlu0 %11  }
  0x7d   :  { %14 = vst.msk [vmem:[#allocation0] sm:$0x1] %vm13_vm1, %v12_v3  }
  0x84   :  { %v18_v4 = vld [vmem:[#allocation0] sm:$0x1] }
  0x85   :  { %20 = vst [vmem:[%s40_s1] sm:$0x1] %v18_v4 }

// kernel: bert_forward.1
= control target key start
LH: loop header
LB: loop body
LE: loop exit
PB: predicated region body
PF: predicated region fallthrough
CT: control target
= control target key end

     0   :  { %s3638_s0 = inlined_call_operand.vmem [shape: s32[16,1], index: 0, kind: input, shape index: {}]   ;;  %s3639_s1 = inlined_call_operand.vmem [shape: s32[16,1], index: 1, kind: input, shape index: {}]   ;;  %s3640_s2 = inlined_call_operand.vmem [shape: f32[16,16], index: 2, kind: input, shape index: {}]   ;;  %s3641_s3 = inlined_call_operand.vmem [shape: f32[100,32], index: 3, kind: input, shape index: {}]   ;;  %s3642_s4 = inlined_call_operand.vmem [shape: f32[8,32], index: 4, kind: input, shape index: {}]   ;;  %s3643_s5 = inlined_call_operand.vmem [shape: f32[2,32], index: 5, kind: input, shape index: {}]   ;;  %s3644_s6 = inlined_call_operand.vmem [shape: f32[1,32], index: 6, kind: input, shape index: {}]   ;;  %s3645_s7 = inlined_call_operand.vmem [shape: f32[1,32], index: 7, kind: input, shape index: {}]   ;;  %s3646_s8 = inlined_call_operand.vmem [shape: f32[2,32,96], index: 8, kind: input, shape index: {}]   ;;  %s3647_s9 = inlined_call_operand.vmem [shape: f32[2,1,96], index: 9, kind: input, shape index: {}]   ;;  %s3648_s10 = inlined_call_operand.vmem [shape: f32[2,32,32], index: 10, kind: input, shape index: {}]   ;;  %s3649_s11 = inlined_call_operand.vmem [shape: f32[2,1,32], index: 11, kind: input, shape index: {}]   ;;  %s3650_s12 = inlined_call_operand.vmem [shape: f32[2,1,32], index: 12, kind: input, shape index: {}]   ;;  %s3651_s13 = inlined_call_operand.vmem [shape: f32[2,1,32], index: 13, kind: input, shape index: {}]   ;;  %s3652_s14 = inlined_call_operand.vmem [shape: f32[2,32,64], index: 14, kind: input, shape index: {}]   ;;  %s3653_s15 = inlined_call_operand.vmem [shape: f32[2,1,64], index: 15, kind: input, shape index: {}]   ;;  %s3654_s16 = inlined_call_operand.vmem [shape: f32[2,64,32], index: 16, kind: input, shape index: {}]   ;;  %s3655_s17 = inlined_call_operand.vmem [shape: f32[2,1,32], index: 17, kind: input, shape index: {}]   ;;  %s3656_s18 = inlined_call_operand.vmem [shape: f32[2,1,32], index: 18, kind: input, shape index: {}]   ;;  %s3657_s19 = inlined_call_operand.vmem [shape: f32[2,1,32], index: 19, kind: input, shape index: {}]   ;;  %s3658_s20 = inlined_call_operand.vmem [shape: f32[32,32], index: 20, kind: input, shape index: {}]   ;;  %s3659_s21 = inlined_call_operand.vmem [shape: f32[1,32], index: 21, kind: input, shape index: {}]   ;;  %s3660_s22 = inlined_call_operand.vmem [shape: f32[32,2], index: 22, kind: input, shape index: {}]   ;;  %s3661_s23 = inlined_call_operand.vmem [shape: f32[1,2], index: 23, kind: input, shape index: {}]   ;;  %s3662_s24 = inlined_call_operand.hbm [shape: f32[2,2], index: 24, kind: output, shape index: {}]  }
   0x1   :  { %3668 = sst [smem:[#allocation5_spill]] %s3638_s0 }
   0x2   :  { %3669 = sst [smem:[#allocation6_spill]] %s3639_s1 }
   0x3   :  { %3670 = sst [smem:[#allocation7_spill]] %s3640_s2 }
   0x4   :  { %3671 = sst [smem:[#allocation8_spill]] %s3641_s3 }
   0x5   :  { %3672 = sst [smem:[#allocation9_spill]] %s3642_s4 }
   0x6   :  { %3673 = sst [smem:[#allocation10_spill]] %s3643_s5 }
   0x7   :  { %3674 = sst [smem:[#allocation11_spill]] %s3644_s6 }
   0x8   :  { %3675 = sst [smem:[#allocation12_spill]] %s3645_s7 }
   0x9   :  { %3676 = sst [smem:[#allocation13_spill]] %s3646_s8 }
   0xa   :  { %s3677_s27 = sld [smem:[#allocation5_spill]]  ;;  %v3060_v2 = vmov 0   ;;  %s3678_s0 = sld [smem:[#allocation8_spill]] }
   0xb   :  { %2933 = vset.pattern.permute.xlu1 %v3060_v2  ;;  %2932 = vset.pattern.permute.xlu0 %v3060_v2  ;;  %s3679_s8 = sld [smem:[#allocation6_spill]] }
  0x10   :  { %v79_v0 = vld [vmem:[%s3677_s27 + $0x8] sm:$0xff]  ;;  %v78_v1 = vld [vmem:[%s3677_s27] sm:$0xff]  ;;  %v96_v7 = vld [vmem:[%s3678_s0 + $0x10] sm:$0xff] }
  0x11   :  { %v94_v3 = vld [vmem:[%s3678_s0] sm:$0xff]  ;;  %v95_v4 = vld [vmem:[%s3678_s0 + $0x8] sm:$0xff]  ;;  %86 = vperm.xlu1 %2933, %v79_v0   ;;  %83 = vperm.xlu0 %2932, %v78_v1   ;;  %v97_v8 = vld [vmem:[%s3678_s0 + $0x18] sm:$0xff] }
  0x12   :  { %v108_v5 = vld [vmem:[%s3679_s8 + $0x8] sm:$0xff]  ;;  %v2761_v6 = vpack.c.bf16 %v95_v4, %v94_v3  ;;  %v107_v9 = vld [vmem:[%s3679_s8] sm:$0xff]  ;;  %v2765_v10 = vpack.c.bf16 %v97_v8, %v96_v7 }
  0x13   :  { %v98_v11 = vld [vmem:[%s3678_s0 + $0x20] sm:$0xff]  ;;  %v99_v12 = vld [vmem:[%s3678_s0 + $0x28] sm:$0xff] }
  0x14   :  { %2762 = vmatprep.subr.bf16.mxu0 %v2761_v6 }
  0x15   :  { %2764 = vmatpush3.bf16.msra.mxu0 %v2761_v6 }
  0x16   :  { %29 = vsyncpa [#allocation3], 0  ;;  %113 = vperm.xlu1 %2933, %v108_v5   ;;  %110 = vperm.xlu0 %2932, %v107_v9   ;;  %v2769_v13 = vpack.c.bf16 %v99_v12, %v98_v11  ;;  %s3680_s25 = sld [smem:[#allocation10_spill]]  ;;  %vm129_vm0 = vcmask 1041408   ;;  %v100_v15 = vld [vmem:[%s3678_s0 + $0x30] sm:$0xff]  ;;  %v101_v16 = vld [vmem:[%s3678_s0 + $0x38] sm:$0xff]  ;;  %v80_v25 = vlaneseq }
  0x17   :  { %2766 = vmatprep.subr.bf16.mxu0 %v2765_v10  ;;  %v2773_v17 = vpack.c.bf16 %v101_v16, %v100_v15  ;;  %v102_v18 = vld [vmem:[%s3678_s0 + $0x40] sm:$0xff]  ;;  %v103_v19 = vld [vmem:[%s3678_s0 + $0x48] sm:$0xff]  ;;  %v104_v21 = vld [vmem:[%s3678_s0 + $0x50] sm:$0xff]  ;;  %vm216_vm1 = vcmask 1043456   ;;  %vm209_vm2 = vcmask 818176   ;;  %v3061_v29 = vmov 0.0  }
  0x18   :  { %v2777_v20 = vpack.c.bf16 %v103_v19, %v102_v18  ;;  %v105_v22 = vld [vmem:[%s3678_s0 + $0x58] sm:$0xff]  ;;  %v106_v24 = vld [vmem:[%s3678_s0 + $0x60] sm:$0xf]  ;;  %v81_v26 = vand.u32 127, %v80_v25  ;;  %vm122_vm5 = vcmask 15360   ;;  %s3681_s4 = sld [smem:[#allocation9_spill]] }
  0x19   :  { %2768 = vmatpush3.bf16.msra.mxu0 %v2765_v10  ;;  %v2781_v23 = vpack.c.bf16 %v105_v22, %v104_v21  ;;  %vm299_vm8 = vcmask 261120   ;;  %s3682_s26 = sld [smem:[#allocation13_spill]]  ;;  %v2341_v15 = vld [vmem:[%s3647_s9] ss:$0 sm:$0xff]  ;;  %vm443_vm9 = vcmask 130048   ;;  %s3062_s27 = smov 96  }
  0x1a   :  { %2770 = vmatprep.subr.bf16.mxu0 %v2769_v13  ;;  %s3063_s28 = smov 64   ;;  %s3064_s6 = smov 112   ;;  %vm3301_vm10 = vmpackc.low %vm443_vm9, %vm443_vm9  ;;  %vm1109_vm11 = vcmask 523264   ;;  %vm3069_vm12 = vmmov 0   ;;  %vm2142_vm13 = vcmask 1040384   ;;  %vm2313_vm14 = vcmask 9216  }
  0x1b   :  { %s3687_s7 = sld [smem:[#allocation7_spill]]  ;;  %s3066_s0 = smov 48  }
  0x1c   :  { %v121_v14 = vld [vmem:[%s3680_s25] sm:$0x3]  ;;  %s3683_s25 = sld [smem:[#allocation11_spill]]  ;;  %s3067_s3 = smov 16  }
  0x1d   :  { %2545 = vmatprep.subr.msk.mxu1 %vm129_vm0, %v121_v14  ;;  %2772 = vmatpush3.bf16.msra.mxu0 %v2769_v13 }
  0x1e   :  { %2546 = vmatpush3.msk.msra.mxu1 %vm129_vm0, %v121_v14  ;;  %2774 = vmatprep.subr.bf16.mxu0 %v2773_v17  ;;  %v208_v39 = vld [vmem:[%s3681_s4] sm:$0xff]  ;;  %s3684_s4 = sld [smem:[#allocation12_spill]] }
  0x1f   :  { %v345_v57 = vld [vmem:[%s3682_s26] sm:$0xff]  ;;  %v346_v58 = vld [vmem:[%s3682_s26 + $0x8] sm:$0xff]  ;;  %v347_v60 = vld [vmem:[%s3682_s26 + $0x10] sm:$0xff] }
  0x20   :  { %v2785_v59 = vpack.c.bf16 %v346_v58, %v345_v57  ;;  %v348_v61 = vld [vmem:[%s3682_s26 + $0x18] sm:$0xff] }
  0x21   :  { %2776 = vmatpush3.bf16.msra.mxu0 %v2773_v17  ;;  %v2789_v62 = vpack.c.bf16 %v348_v61, %v347_v60 }
  0x22   :  { %2778 = vmatprep.subr.bf16.mxu0 %v2777_v20  ;;  %2786 = vmatprep.subr.bf16.mxu1 %v2785_v59  ;;  %v2339_v6 = vld [vmem:[%s3683_s25] ss:$0 sm:$0xff]  ;;  %s3065_s25 = smov 80  }
  0x24   :  { %v2340_v8 = vld [vmem:[%s3684_s4] ss:$0 sm:$0xff] }
  0x25   :  { %2780 = vmatpush3.bf16.msra.mxu0 %v2777_v20 }
  0x26   :  { %2782 = vmatprep.subr.bf16.mxu0 %v2781_v23 }
  0x29   :  { %2784 = vmatpush3.bf16.msra.mxu0 %v2781_v23 }
  0x2a   :  { %2574 = vmatprep.subr.msk.mxu0 %vm216_vm1, %v106_v24 }
  0x2d   :  { %2575 = vmatpush3.msk.msra.mxu0 %vm216_vm1, %v106_v24 }
  0x90   :  { %v87_v27 = vpop.permute.xlu1 %86  ;;  %v84_v28 = vpop.permute.xlu0 %83 }
  0x91   :  { %vm89_vm3 = vcmp.eq.s32.totalorder %v81_v26, %v87_v27  ;;  %vm88_vm4 = vcmp.eq.s32.totalorder %v81_v26, %v84_v28 }
  0x92   :  { %v2330_v30 = vsel %vm89_vm3, 1.0, %v3061_v29  ;;  %v2329_v31 = vsel %vm88_vm4, 1.0, %v3061_v29 }
  0x93   :  { %2576 = vmatprep.mubr.msk.f32.mxu0 %vm209_vm2, %v2329_v31 }
  0x94   :  { %2577 = vmatmul.mubr.msk.f32.vlgmr.msra.gmra.mrb[0].mxu0 %vm209_vm2, %v2330_v30 }
  0x95   :  { %v114_v32 = vpop.permute.xlu1 %113  ;;  %v111_v33 = vpop.permute.xlu0 %110 }
  0x96   :  { %vm116_vm6 = vcmp.eq.s32.totalorder %v81_v26, %v114_v32  ;;  %vm115_vm7 = vcmp.eq.s32.totalorder %v81_v26, %v111_v33  ;;  %v3313_v33 = vld [vmem:[%s3687_s7] sm:$0xff] }
  0x97   :  { %v2332_v34 = vsel %vm116_vm6, 1.0, %v3061_v29  ;;  %v2331_v35 = vsel %vm115_vm7, 1.0, %v3061_v29 }
  0x98   :  { %2547 = vmatprep.mubr.msk.f32.mxu1 %vm122_vm5, %v2331_v35 }
  0x99   :  { %2548 = vmatmul.mubr.msk.f32.vlgmr.msra.gmra.mrb[0].mxu1 %vm122_vm5, %v2332_v34 }
  0x9a   :  { %2788 = vmatpush3.bf16.msra.mxu1 %v2785_v59 }
  0x9b   :  { %2790 = vmatprep.subr.bf16.mxu1 %v2789_v62 }
  0x9e   :  { %2792 = vmatpush3.bf16.msra.mxu1 %v2789_v62 }
 0x167   :  { %v2578_v36 = vpop.f32.mrb[0].mxu0 }
 0x168   :  { %v286_v37 = vpop.f32.mrb[1].mxu0 }
 0x16c   :  { %v2549_v38 = vpop.f32.mrb[0].mxu1 }
 0x16d   :  { %v2917_v40 = vadd.f32 %v2578_v36, %v2549_v38  ;;  %v199_v41 = vpop.f32.mrb[1].mxu1  ;;  %v3318_v36 = vld [vmem:[%s3687_s7 + $0x8] sm:$0xff] }
 0x16e   :  { %v2919_v42 = vadd.f32 %v286_v37, %v199_v41 }
 0x16f   :  { %v2918_v43 = vadd.f32 %v2917_v40, %v208_v39 }
 0x170   :  { %v2920_v44 = vadd.f32 %v2919_v42, %v208_v39 }
 0x171   :  { %v303_v45 = vsel %vm299_vm8, %v2918_v43, 0.0 }
 0x172   :  { %304 = vadd.xlane.f32.xlu1 %v303_v45  ;;  %v300_v46 = vsel %vm299_vm8, %v2920_v44, 0.0 }
 0x173   :  { %301 = vadd.xlane.f32.xlu0 %v300_v46 }
 0x1ff   :  { %v305_v47 = vpop.xlane.xlu1 %304 }
 0x200   :  { %v308_v48 = vmul.f32 0.03125, %v305_v47  ;;  %v302_v49 = vpop.xlane.xlu0 %301 }
 0x201   :  { %v307_v50 = vmul.f32 0.03125, %v302_v49 }
 0x202   :  { %v310_v51 = vsub.f32 %v2918_v43, %v308_v48 }
 0x203   :  { %v309_v52 = vsub.f32 %v2920_v44, %v307_v50 }
 0x204   :  { %v312_v55 = vmul.f32 %v310_v51, %v310_v51 }
 0x205   :  { %v311_v53 = vmul.f32 %v309_v52, %v309_v52 }
 0x206   :  { %v316_v56 = vsel %vm299_vm8, %v312_v55, 0.0 }
 0x207   :  { %v313_v54 = vsel %vm299_vm8, %v311_v53, 0.0 }
 0x208   :  { %314 = vadd.xlane.f32.xlu0 %v313_v54 }
 0x20c   :  { %317 = vadd.xlane.f32.xlu0 %v316_v56 }
 0x295   :  { %v315_v63 = vpop.xlane.xlu0 %314 }
 0x296   :  { %v319_v0 = vmul.f32 0.03125, %v315_v63 }
 0x298   :  { %v321_v1 = vadd.f32 1e-12, %v319_v0 }
 0x299   :  { %v318_v2 = vpop.xlane.xlu0 %317 }
 0x29a   :  { %2974 = vrsqrt.f32 %v321_v1  ;;  %v320_v3 = vmul.f32 0.03125, %v318_v2 }
 0x29c   :  { %v322_v4 = vadd.f32 1e-12, %v320_v3 }
 0x29e   :  { %2976 = vrsqrt.f32 %v322_v4 }
 0x2a4   :  { %v2975_v5 = vpop.eup %2974 }
 0x2a5   :  { %v325_v7 = vmul.f32 %v2975_v5, %v309_v52 }
 0x2a7   :  { %v333_v9 = vmul.f32 %v2339_v6, %v325_v7 }
 0x2a8   :  { %v2977_v10 = vpop.eup %2976 }
 0x2a9   :  { %v326_v11 = vmul.f32 %v2977_v10, %v310_v51  ;;  %v3279_v12 = vadd.f32 %v2340_v8, %v333_v9 }
 0x2ab   :  { %v334_v13 = vmul.f32 %v2339_v6, %v326_v11  ;;  %2587 = vmatprep.mubr.msk.f32.mxu1 %vm299_vm8, %v3279_v12 }
 0x2ad   :  { %v3283_v14 = vadd.f32 %v2340_v8, %v334_v13 }
 0x2af   :  { %2588 = vmatmul.mubr.msk.f32.vlgmr.msra.gmra.mrb[2].mxu1 %vm299_vm8, %v3283_v14 }
 0x382   :  { %v2589_v16 = vpop.f32.mrb[2].mxu1 }
 0x383   :  { %v434_v17 = vadd.f32 %v2589_v16, %v2341_v15  ;;  %v428_v18 = vpop.f32.mrb[3].mxu1 }
 0x384   :  { %v429_v19 = vadd.f32 %v2341_v15, %v428_v18 }
 0x386   :  { %2594 = vmatprep.mubr.msk.f32.mxu1 %vm443_vm9, %v429_v19  ;;  %v3291_v20 = vpack.i.bf16 %v434_v17, %v429_v19 }
 0x388   :  { %2935 = vrot.lane.b32.xlu1 %v3291_v20, %s3062_s27 }
 0x38c   :  { %2940 = vrot.lane.b32.xlu1 %v3291_v20, %s3063_s28 }
 0x390   :  { %640 = vrot.lane.b32.xlu1 %v429_v19, %s3064_s6 }
 0x394   :  { %642 = vrot.lane.b32.xlu1 %v434_v17, %s3064_s6 }
 0x3fa   :  { %v2936_v21 = vpop.permute.xlu1 %2935 }
 0x3fb   :  { %v2938_v22 = vunpack.i.h.bf16 %v2936_v21  ;;  %v2937_v23 = vunpack.i.l.bf16 %v2936_v21 }
 0x3fd   :  { %v2793_v25 = vpack.c.bf16 %v2938_v22, %v2937_v23 }
 0x3fe   :  { %v2941_v26 = vpop.permute.xlu1 %2940 }
 0x3ff   :  { %v2943_v27 = vunpack.i.h.bf16 %v2941_v26  ;;  %v2942_v28 = vunpack.i.l.bf16 %v2941_v26  ;;  %2795 = vmatprep.subr.msk.bf16.mxu1 %vm3301_vm10, %v2793_v25 }
 0x400   :  { %2798 = vmatpush3.bf16.xpose.msk.msra.mxu1 %vm3301_vm10, %v2793_v25 }
 0x401   :  { %v2799_v30 = vpack.c.bf16 %v2943_v27, %v2942_v28 }
 0x402   :  { %v641_v61 = vpop.permute.xlu1 %640 }
 0x403   :  { %2800 = vmatprep.subr.bf16.mxu1 %v2799_v30 }
 0x406   :  { %v643_v62 = vpop.permute.xlu1 %642 }
 0x407   :  { %2595 = vmatmul.mubr.msk.f32.vlgmr.msra.gmra.mrb[4].mxu1 %vm443_vm9, %v434_v17 }
 0x408   :  { %2802 = vmatpush3.bf16.msra.mxu1 %v2799_v30 }
 0x4da   :  { %v2596_v31 = vpop.f32.mrb[4].mxu1 }
 0x4db   :  { %v518_v32 = vpop.f32.mrb[5].mxu1  ;;  %v528_v34 = vmul.f32 0.25, %v2596_v31 }
 0x4dc   :  { %v527_v35 = vmul.f32 0.25, %v518_v32 }
 0x4dd   :  { %v530_v39 = vadd.f32 %v528_v34, %v3318_v36  ;;  %v854_v34 = vld [vmem:[%s3648_s10] sm:$0xff] }
 0x4de   :  { %v529_v37 = vadd.f32 %v527_v35, %v3313_v33  ;;  %v855_v35 = vld [vmem:[%s3648_s10 + $0x8] sm:$0xff] }
 0x4df   :  { %v534_v40 = vsel %vm443_vm9, %v530_v39, -inf }
 0x4e0   :  { %v531_v38 = vsel %vm443_vm9, %v529_v37, -inf }
 0x4e1   :  { %532 = vmax.xlane.f32.xlu0 %v531_v38  ;;  %v856_v38 = vld [vmem:[%s3648_s10 + $0x10] sm:$0xff] }
 0x4e5   :  { %535 = vmax.xlane.f32.xlu0 %v534_v40 }
 0x56e   :  { %v533_v41 = vpop.xlane.xlu0 %532 }
 0x56f   :  { %v537_v42 = vsub.f32 %v529_v37, %v533_v41  ;;  %v2813_v37 = vpack.c.bf16 %v855_v35, %v854_v34  ;;  %v1099_v34 = vld [vmem:[%s3654_s16 + $0x28] sm:$0xff] }
 0x571   :  { %v539_v45 = vmul.f32 1.442695, %v537_v42 }
 0x572   :  { %v536_v43 = vpop.xlane.xlu0 %535 }
 0x573   :  { %v538_v44 = vsub.f32 %v530_v39, %v536_v43  ;;  %v857_v39 = vld [vmem:[%s3648_s10 + $0x18] sm:$0xff] }
 0x574   :  { %v2817_v40 = vpack.c.bf16 %v857_v39, %v856_v38  ;;  %v1101_v38 = vld [vmem:[%s3654_s16 + $0x38] sm:$0xff] }
 0x575   :  { %v541_v46 = vmul.f32 1.442695, %v538_v44 }
 0x577   :  { %2978 = vpow2.f32 %v541_v46 }
 0x578   :  { %2980 = vpow2.f32 %v539_v45 }
 0x581   :  { %v2979_v47 = vpop.eup %2978 }
 0x582   :  { %v546_v48 = vsel %vm443_vm9, %v2979_v47, 0.0  ;;  %v2981_v49 = vpop.eup %2980 }
 0x583   :  { %547 = vadd.xlane.f32.xlu0 %v546_v48  ;;  %v543_v50 = vsel %vm443_vm9, %v2981_v49, 0.0 }
 0x587   :  { %544 = vadd.xlane.f32.xlu0 %v543_v50 }
 0x59d   :  { %2945 = vrot.lane.b32.xlu0 %v3291_v20, %s3065_s25 }
 0x610   :  { %v548_v51 = vpop.xlane.xlu0 %547 }
 0x611   :  { %2982 = vrcp.f32 %v548_v51 }
 0x614   :  { %v545_v52 = vpop.xlane.xlu0 %544 }
 0x615   :  { %2984 = vrcp.f32 %v545_v52 }
 0x618   :  { %v2946_v53 = vpop.permute.xlu0 %2945 }
 0x619   :  { %v2948_v54 = vunpack.i.h.bf16 %v2946_v53  ;;  %v2947_v55 = vunpack.i.l.bf16 %v2946_v53 }
 0x61b   :  { %v2803_v56 = vpack.c.bf16 %v2948_v54, %v2947_v55  ;;  %v2983_v57 = vpop.eup %2982 }
 0x61c   :  { %v552_v60 = vmul.f32 %v2983_v57, %v2979_v47  ;;  %v2356_v47 = vld [vmem:[%s3649_s11] ss:$0 sm:$0xff] }
 0x61d   :  { %2805 = vmatprep.subr.msk.bf16.mxu1 %vm3301_vm10, %v2803_v56 }
 0x61f   :  { %v2985_v58 = vpop.eup %2984 }
 0x620   :  { %v551_v59 = vmul.f32 %v2985_v58, %v2981_v49 }
 0x622   :  { %2601 = vmatprep.mubr.msk.f32.mxu1 %vm443_vm9, %v551_v59 }
 0x623   :  { %2602 = vmatmul.mubr.msk.f32.vlgmr.msra.gmra.mrb[6].mxu1 %vm443_vm9, %v552_v60 }
 0x624   :  { %2808 = vmatpush3.bf16.xpose.msk.msra.mxu1 %vm3301_vm10, %v2803_v56  ;;  %2608 = vmatprep.mubr.msk.f32.mxu1 %vm443_vm9, %v641_v61 }
 0x625   :  { %2814 = vmatprep.subr.bf16.mxu1 %v2813_v37 }
 0x62b   :  { %2609 = vmatmul.mubr.msk.f32.vlgmr.msra.gmra.mrb[8].mxu1 %vm443_vm9, %v643_v62 }
 0x62c   :  { %2816 = vmatpush3.bf16.msra.mxu1 %v2813_v37  ;;  %v1100_v37 = vld [vmem:[%s3654_s16 + $0x30] sm:$0xff] }
 0x62d   :  { %2818 = vmatprep.subr.bf16.mxu1 %v2817_v40  ;;  %v2841_v39 = vpack.c.bf16 %v1101_v38, %v1100_v37 }
 0x630   :  { %2820 = vmatpush3.bf16.msra.mxu1 %v2817_v40  ;;  %v2361_v40 = vld [vmem:[%s3653_s15] ss:$0 sm:$0xff] }
 0x6f6   :  { %v3336_v63 = vpop.f32.mrb[6].mxu1 }
 0x6f7   :  { %v631_v0 = vpop.f32.mrb[7].mxu1 }
 0x6fe   :  { %v2610_v1 = vpop.f32.mrb[8].mxu1 }
 0x6ff   :  { %v732_v2 = vmul.f32 0.25, %v2610_v1  ;;  %v722_v3 = vpop.f32.mrb[9].mxu1  ;;  %v993_v1 = vld [vmem:[%s3652_s14 + $0x8] sm:$0xff] }
 0x700   :  { %v731_v4 = vmul.f32 0.25, %v722_v3  ;;  %v994_v3 = vld [vmem:[%s3652_s14 + $0x10] sm:$0xff] }
 0x701   :  { %v734_v5 = vadd.f32 %v732_v2, %v3318_v36 }
 0x702   :  { %v733_v6 = vadd.f32 %v731_v4, %v3313_v33  ;;  %v995_v4 = vld [vmem:[%s3652_s14 + $0x18] sm:$0xff] }
 0x703   :  { %v738_v7 = vsel %vm443_vm9, %v734_v5, -inf }
 0x704   :  { %739 = vmax.xlane.f32.xlu0 %v738_v7  ;;  %v735_v8 = vsel %vm443_vm9, %v733_v6, -inf }
 0x705   :  { %736 = vmax.xlane.f32.xlu1 %v735_v8 }
 0x71a   :  { %2950 = vrot.lane.b32.xlu0 %v3291_v20, %s3066_s0 }
 0x791   :  { %v740_v9 = vpop.xlane.xlu0 %739 }
 0x792   :  { %v742_v10 = vsub.f32 %v734_v5, %v740_v9  ;;  %v737_v11 = vpop.xlane.xlu1 %736  ;;  %v2825_v5 = vpack.c.bf16 %v995_v4, %v994_v3 }
 0x793   :  { %v741_v13 = vsub.f32 %v733_v6, %v737_v11 }
 0x794   :  { %v745_v15 = vmul.f32 1.442695, %v742_v10 }
 0x795   :  { %v743_v16 = vmul.f32 1.442695, %v741_v13  ;;  %v2951_v17 = vpop.permute.xlu0 %2950 }
 0x796   :  { %v2953_v18 = vunpack.i.h.bf16 %v2951_v17  ;;  %v2952_v19 = vunpack.i.l.bf16 %v2951_v17  ;;  %v2360_v17 = vld [vmem:[%s3651_s13] ss:$0 sm:$0xff] }
 0x797   :  { %2986 = vpow2.f32 %v743_v16 }
 0x798   :  { %v2809_v21 = vpack.c.bf16 %v2953_v18, %v2952_v19  ;;  %2988 = vpow2.f32 %v745_v15  ;;  %v2359_v15 = vld [vmem:[%s3650_s12] ss:$0 sm:$0xff] }
 0x79a   :  { %2810 = vmatprep.subr.bf16.mxu0 %v2809_v21 }
 0x79b   :  { %2812 = vmatpush3.bf16.msra.mxu0 %v2809_v21 }
 0x7a1   :  { %v2987_v22 = vpop.eup %2986 }
 0x7a2   :  { %v747_v23 = vsel %vm443_vm9, %v2987_v22, 0.0  ;;  %v2989_v25 = vpop.eup %2988 }
 0x7a3   :  { %748 = vadd.xlane.f32.xlu1 %v747_v23  ;;  %v750_v20 = vsel %vm443_vm9, %v2989_v25, 0.0 }
 0x7a7   :  { %751 = vadd.xlane.f32.xlu1 %v750_v20  ;;  %v1094_v20 = vld [vmem:[%s3654_s16] sm:$0xff] }
 0x830   :  { %v749_v26 = vpop.xlane.xlu1 %748 }
 0x831   :  { %2990 = vrcp.f32 %v749_v26  ;;  %v1095_v26 = vld [vmem:[%s3654_s16 + $0x8] sm:$0xff] }
 0x834   :  { %v752_v27 = vpop.xlane.xlu1 %751 }
 0x835   :  { %2992 = vrcp.f32 %v752_v27  ;;  %v2829_v27 = vpack.c.bf16 %v1095_v26, %v1094_v20 }
 0x837   :  { %2830 = vmatprep.subr.bf16.mxu1 %v2829_v27 }
 0x83b   :  { %v2991_v28 = vpop.eup %2990 }
 0x83c   :  { %v755_v30 = vmul.f32 %v2991_v28, %v2987_v22  ;;  %v1096_v28 = vld [vmem:[%s3654_s16 + $0x10] sm:$0xff] }
 0x83e   :  { %2615 = vmatprep.mubr.msk.f32.mxu0 %vm443_vm9, %v755_v30  ;;  %v1097_v30 = vld [vmem:[%s3654_s16 + $0x18] sm:$0xff] }
 0x83f   :  { %v2993_v31 = vpop.eup %2992 }
 0x840   :  { %v756_v32 = vmul.f32 %v2993_v31, %v2989_v25  ;;  %v2833_v31 = vpack.c.bf16 %v1097_v30, %v1096_v28  ;;  %v2368_v28 = vld [vmem:[%s3657_s19] ss:$0 sm:$0xff] }
 0x842   :  { %2616 = vmatmul.mubr.msk.f32.vlgmr.msra.gmra.mrb[2].mxu0 %vm443_vm9, %v756_v32  ;;  %v1098_v32 = vld [vmem:[%s3654_s16 + $0x20] sm:$0xff] }
 0x843   :  { %v2837_v35 = vpack.c.bf16 %v1099_v34, %v1098_v32 }
 0x915   :  { %v2617_v41 = vpop.f32.mrb[2].mxu0 }
 0x916   :  { %v835_v42 = vpop.f32.mrb[3].mxu0 }
 0x917   :  { %846 = vrot.lane.b32.xlu1 %v835_v42, %s3067_s3 }
 0x91b   :  { %848 = vrot.lane.b32.xlu1 %v2617_v41, %s3067_s3 }
 0x989   :  { %v847_v43 = vpop.permute.xlu1 %846 }
 0x98a   :  { %v852_v44 = vsel %vm443_vm9, %v631_v0, %v847_v43 }
 0x98b   :  { %2626 = vmatprep.mubr.msk.f32.mxu1 %vm299_vm8, %v852_v44 }
 0x98d   :  { %v849_v45 = vpop.permute.xlu1 %848 }
 0x98e   :  { %v853_v46 = vsel %vm443_vm9, %v3336_v63, %v849_v45 }
 0x98f   :  { %2627 = vmatmul.mubr.msk.f32.vlgmr.msra.gmra.mrb[10].mxu1 %vm299_vm8, %v853_v46 }
 0x990   :  { %2832 = vmatpush3.bf16.msra.mxu1 %v2829_v27 }
 0x991   :  { %2834 = vmatprep.subr.bf16.mxu1 %v2833_v31 }
 0x994   :  { %2836 = vmatpush3.bf16.msra.mxu1 %v2833_v31 }
 0x995   :  { %2838 = vmatprep.subr.bf16.mxu1 %v2837_v35 }
 0x998   :  { %2840 = vmatpush3.bf16.msra.mxu1 %v2837_v35  ;;  %v2374_v35 = vld [vmem:[%s3647_s9 + $0x1] ss:$0 sm:$0xff] }
 0x999   :  { %2842 = vmatprep.subr.bf16.mxu1 %v2841_v39 }
 0x99c   :  { %2844 = vmatpush3.bf16.msra.mxu1 %v2841_v39 }
 0xa62   :  { %v2628_v48 = vpop.f32.mrb[10].mxu1 }
 0xa63   :  { %v943_v49 = vadd.f32 %v2628_v48, %v2356_v47  ;;  %v937_v50 = vpop.f32.mrb[11].mxu1 }
 0xa64   :  { %v938_v51 = vadd.f32 %v2356_v47, %v937_v50 }
 0xa65   :  { %v947_v52 = vadd.f32 %v943_v49, %v3283_v14 }
 0xa66   :  { %v946_v53 = vadd.f32 %v938_v51, %v3279_v12  ;;  %v992_v12 = vld [vmem:[%s3652_s14] sm:$0xff] }
 0xa67   :  { %v953_v54 = vsel %vm299_vm8, %v947_v52, 0.0  ;;  %v2821_v2 = vpack.c.bf16 %v993_v1, %v992_v12 }
 0xa68   :  { %954 = vadd.xlane.f32.xlu1 %v953_v54  ;;  %v950_v55 = vsel %vm299_vm8, %v946_v53, 0.0 }
 0xa69   :  { %951 = vadd.xlane.f32.xlu0 %v950_v55  ;;  %2822 = vmatprep.subr.bf16.mxu0 %v2821_v2  ;;  %v2364_v55 = vld [vmem:[%s3655_s17] ss:$0 sm:$0xff] }
 0xa6a   :  { %2824 = vmatpush3.bf16.msra.mxu0 %v2821_v2 }
 0xa6b   :  { %2826 = vmatprep.subr.bf16.mxu0 %v2825_v5 }
 0xa6e   :  { %2828 = vmatpush3.bf16.msra.mxu0 %v2825_v5 }
 0xaf5   :  { %v955_v56 = vpop.xlane.xlu1 %954 }
 0xaf6   :  { %v957_v57 = vmul.f32 0.03125, %v955_v56  ;;  %v952_v58 = vpop.xlane.xlu0 %951 }
 0xaf7   :  { %v956_v59 = vmul.f32 0.03125, %v952_v58 }
 0xaf8   :  { %v959_v60 = vsub.f32 %v947_v52, %v957_v57 }
 0xaf9   :  { %v958_v61 = vsub.f32 %v946_v53, %v956_v59 }
 0xafa   :  { %v961_v0 = vmul.f32 %v959_v60, %v959_v60 }
 0xafb   :  { %v960_v62 = vmul.f32 %v958_v61, %v958_v61 }
 0xafc   :  { %v965_v14 = vsel %vm299_vm8, %v961_v0, 0.0 }
 0xafd   :  { %v962_v63 = vsel %vm299_vm8, %v960_v62, 0.0 }
 0xafe   :  { %963 = vadd.xlane.f32.xlu0 %v962_v63 }
 0xb02   :  { %966 = vadd.xlane.f32.xlu0 %v965_v14 }
 0xb8b   :  { %v964_v6 = vpop.xlane.xlu0 %963 }
 0xb8c   :  { %v968_v7 = vmul.f32 0.03125, %v964_v6 }
 0xb8e   :  { %v970_v8 = vadd.f32 1e-12, %v968_v7 }
 0xb8f   :  { %v967_v9 = vpop.xlane.xlu0 %966 }
 0xb90   :  { %2994 = vrsqrt.f32 %v970_v8  ;;  %v969_v10 = vmul.f32 0.03125, %v967_v9  ;;  %v2369_v8 = vld [vmem:[%s3682_s26 + $0x20] sm:$0xff]  ;;  %v2370_v9 = vld [vmem:[%s3682_s26 + $0x28] sm:$0xff] }
 0xb92   :  { %v971_v11 = vadd.f32 1e-12, %v969_v10  ;;  %v2845_v10 = vpack.c.bf16 %v2370_v9, %v2369_v8 }
 0xb94   :  { %2996 = vrsqrt.f32 %v971_v11  ;;  %2846 = vmatprep.subr.bf16.mxu0 %v2845_v10  ;;  %v2371_v11 = vld [vmem:[%s3682_s26 + $0x30] sm:$0xff] }
 0xb9a   :  { %v2995_v13 = vpop.eup %2994 }
 0xb9b   :  { %v974_v16 = vmul.f32 %v2995_v13, %v958_v61  ;;  %v2372_v13 = vld [vmem:[%s3682_s26 + $0x38] sm:$0xff] }
 0xb9d   :  { %v982_v18 = vmul.f32 %v2359_v15, %v974_v16 }
 0xb9e   :  { %v2997_v19 = vpop.eup %2996 }
 0xb9f   :  { %v975_v21 = vmul.f32 %v2997_v19, %v959_v60  ;;  %v990_v22 = vadd.f32 %v2360_v17, %v982_v18 }
 0xba1   :  { %v983_v23 = vmul.f32 %v2359_v15, %v975_v21  ;;  %2637 = vmatprep.mubr.msk.f32.mxu0 %vm299_vm8, %v990_v22  ;;  %v2849_v15 = vpack.c.bf16 %v2372_v13, %v2371_v11 }
 0xba3   :  { %v991_v25 = vadd.f32 %v2360_v17, %v983_v23 }
 0xba5   :  { %2638 = vmatmul.mubr.msk.f32.vlgmr.msra.gmra.mrb[4].mxu0 %vm299_vm8, %v991_v25 }
 0xba6   :  { %2848 = vmatpush3.bf16.msra.mxu0 %v2845_v10 }
 0xba7   :  { %2850 = vmatprep.subr.bf16.mxu0 %v2849_v15 }
 0xbaa   :  { %2852 = vmatpush3.bf16.msra.mxu0 %v2849_v15 }
 0xc78   :  { %v2639_v41 = vpop.f32.mrb[4].mxu0 }
 0xc79   :  { %v1081_v42 = vadd.f32 %v2639_v41, %v2361_v40  ;;  %v1075_v43 = vpop.f32.mrb[5].mxu0 }
 0xc7a   :  { %v1076_v44 = vadd.f32 %v2361_v40, %v1075_v43 }
 0xc7b   :  { %v1087_v45 = vmul.f32 0.70710677, %v1081_v42  ;;  %v1085_v52 = vmul.f32 0.5, %v1081_v42 }
 0xc7c   :  { %v1086_v46 = vmul.f32 0.70710677, %v1076_v44  ;;  %v1084_v50 = vmul.f32 0.5, %v1076_v44 }
 0xc7d   :  { %2998 = verf.f32 %v1087_v45 }
 0xc7e   :  { %3000 = verf.f32 %v1086_v46 }
 0xc87   :  { %v2999_v47 = vpop.eup %2998 }
 0xc88   :  { %v3001_v48 = vpop.eup %3000  ;;  %v1091_v49 = vadd.f32 1.0, %v2999_v47 }
 0xc89   :  { %v1090_v51 = vadd.f32 1.0, %v3001_v48 }
 0xc8a   :  { %v1093_v54 = vmul.f32 %v1091_v49, %v1085_v52 }
 0xc8b   :  { %v1092_v53 = vmul.f32 %v1090_v51, %v1084_v50 }
 0xc8d   :  { %2656 = vmatprep.mubr.msk.f32.mxu1 %vm1109_vm11, %v1092_v53 }
 0xc8e   :  { %2657 = vmatmul.mubr.msk.f32.vlgmr.msra.gmra.mrb[12].mxu1 %vm1109_vm11, %v1093_v54 }
 0xd61   :  { %v2658_v56 = vpop.f32.mrb[12].mxu1 }
 0xd62   :  { %v1188_v57 = vadd.f32 %v2658_v56, %v2364_v55  ;;  %v1182_v58 = vpop.f32.mrb[13].mxu1 }
 0xd63   :  { %v1183_v59 = vadd.f32 %v2364_v55, %v1182_v58 }
 0xd64   :  { %v1192_v60 = vadd.f32 %v1188_v57, %v991_v25  ;;  %v2367_v25 = vld [vmem:[%s3656_s18] ss:$0 sm:$0xff] }
 0xd65   :  { %v1191_v61 = vadd.f32 %v1183_v59, %v990_v22 }
 0xd66   :  { %v1198_v62 = vsel %vm299_vm8, %v1192_v60, 0.0 }
 0xd67   :  { %1199 = vadd.xlane.f32.xlu0 %v1198_v62  ;;  %v1195_v63 = vsel %vm299_vm8, %v1191_v61, 0.0 }
 0xd68   :  { %1196 = vadd.xlane.f32.xlu1 %v1195_v63 }
 0xdf4   :  { %v1200_v0 = vpop.xlane.xlu0 %1199 }
 0xdf5   :  { %v1202_v14 = vmul.f32 0.03125, %v1200_v0  ;;  %v1197_v12 = vpop.xlane.xlu1 %1196 }
 0xdf6   :  { %v1201_v1 = vmul.f32 0.03125, %v1197_v12 }
 0xdf7   :  { %v1204_v2 = vsub.f32 %v1192_v60, %v1202_v14 }
 0xdf8   :  { %v1203_v3 = vsub.f32 %v1191_v61, %v1201_v1 }
 0xdf9   :  { %v1206_v4 = vmul.f32 %v1204_v2, %v1204_v2 }
 0xdfa   :  { %v1205_v5 = vmul.f32 %v1203_v3, %v1203_v3 }
 0xdfb   :  { %v1210_v6 = vsel %vm299_vm8, %v1206_v4, 0.0 }
 0xdfc   :  { %1211 = vadd.xlane.f32.xlu0 %v1210_v6  ;;  %v1207_v7 = vsel %vm299_vm8, %v1205_v5, 0.0 }
 0xdfd   :  { %1208 = vadd.xlane.f32.xlu1 %v1207_v7 }
 0xe89   :  { %v1212_v16 = vpop.xlane.xlu0 %1211 }
 0xe8a   :  { %v1214_v17 = vmul.f32 0.03125, %v1212_v16  ;;  %v1209_v18 = vpop.xlane.xlu1 %1208 }
 0xe8b   :  { %v1213_v19 = vmul.f32 0.03125, %v1209_v18 }
 0xe8c   :  { %v1216_v21 = vadd.f32 1e-12, %v1214_v17 }
 0xe8d   :  { %v1215_v22 = vadd.f32 1e-12, %v1213_v19 }
 0xe8e   :  { %3002 = vrsqrt.f32 %v1216_v21 }
 0xe8f   :  { %3004 = vrsqrt.f32 %v1215_v22 }
 0xe98   :  { %v3003_v23 = vpop.eup %3002 }
 0xe99   :  { %v3005_v20 = vpop.eup %3004  ;;  %v1220_v26 = vmul.f32 %v3003_v23, %v1204_v2 }
 0xe9a   :  { %v1219_v27 = vmul.f32 %v3005_v20, %v1203_v3 }
 0xe9b   :  { %v1228_v30 = vmul.f32 %v2367_v25, %v1220_v26 }
 0xe9c   :  { %v1227_v31 = vmul.f32 %v2367_v25, %v1219_v27 }
 0xe9d   :  { %v3452_v34 = vadd.f32 %v2368_v28, %v1228_v30 }
 0xe9e   :  { %v3450_v32 = vadd.f32 %v2368_v28, %v1227_v31 }
 0xea0   :  { %2667 = vmatprep.mubr.msk.f32.mxu0 %vm299_vm8, %v3450_v32 }
 0xea1   :  { %2668 = vmatmul.mubr.msk.f32.vlgmr.msra.gmra.mrb[6].mxu0 %vm299_vm8, %v3452_v34 }
 0xf74   :  { %v2669_v37 = vpop.f32.mrb[6].mxu0 }
 0xf75   :  { %v1328_v38 = vadd.f32 %v2669_v37, %v2374_v35  ;;  %v1322_v39 = vpop.f32.mrb[7].mxu0 }
 0xf76   :  { %v1323_v40 = vadd.f32 %v2374_v35, %v1322_v39 }
 0xf78   :  { %2674 = vmatprep.mubr.msk.f32.mxu0 %vm443_vm9, %v1323_v40  ;;  %v3462_v41 = vpack.i.bf16 %v1328_v38, %v1323_v40 }
 0xf7a   :  { %2960 = vrot.lane.b32.xlu0 %v3462_v41, %s3065_s25  ;;  %2955 = vrot.lane.b32.xlu1 %v3462_v41, %s3062_s27 }
 0xf7e   :  { %1533 = vrot.lane.b32.xlu1 %v1323_v40, %s3064_s6 }
 0xf82   :  { %1535 = vrot.lane.b32.xlu1 %v1328_v38, %s3064_s6 }
 0xfec   :  { %v2961_v42 = vpop.permute.xlu0 %2960  ;;  %v2956_v43 = vpop.permute.xlu1 %2955 }
 0xfed   :  { %v2963_v44 = vunpack.i.h.bf16 %v2961_v42  ;;  %v2962_v45 = vunpack.i.l.bf16 %v2961_v42  ;;  %v2958_v46 = vunpack.i.h.bf16 %v2956_v43  ;;  %v2957_v47 = vunpack.i.l.bf16 %v2956_v43 }
 0xfef   :  { %v2853_v48 = vpack.c.bf16 %v2958_v46, %v2957_v47  ;;  %v2863_v49 = vpack.c.bf16 %v2963_v44, %v2962_v45  ;;  %v2389_v47 = vld [vmem:[%s3648_s10 + $0x20] sm:$0xff] }
 0xff0   :  { %v1534_v50 = vpop.permute.xlu1 %1533 }
 0xff1   :  { %2855 = vmatprep.subr.msk.bf16.mxu0 %vm3301_vm10, %v2853_v48 }
 0xff2   :  { %2858 = vmatpush3.bf16.xpose.msk.msra.mxu0 %vm3301_vm10, %v2853_v48  ;;  %v2390_v48 = vld [vmem:[%s3648_s10 + $0x28] sm:$0xff] }
 0xff3   :  { %2865 = vmatprep.subr.msk.bf16.mxu0 %vm3301_vm10, %v2863_v49 }
 0xff4   :  { %v1536_v51 = vpop.permute.xlu1 %1535 }
 0xff9   :  { %2675 = vmatmul.mubr.msk.f32.vlgmr.msra.gmra.mrb[8].mxu0 %vm443_vm9, %v1328_v38 }
 0xffa   :  { %2868 = vmatpush3.bf16.xpose.msk.msra.mxu0 %vm3301_vm10, %v2863_v49  ;;  %2688 = vmatprep.mubr.msk.f32.mxu0 %vm443_vm9, %v1534_v50  ;;  %v2873_v49 = vpack.c.bf16 %v2390_v48, %v2389_v47  ;;  %v2391_v50 = vld [vmem:[%s3648_s10 + $0x30] sm:$0xff] }
 0xffb   :  { %v2415_v48 = vld [vmem:[%s3654_s16 + $0x70] sm:$0xff] }
0x1001   :  { %2689 = vmatmul.mubr.msk.f32.vlgmr.msra.gmra.mrb[10].mxu0 %vm443_vm9, %v1536_v51  ;;  %v2392_v51 = vld [vmem:[%s3648_s10 + $0x38] sm:$0xff] }
0x10cc   :  { %v2676_v52 = vpop.f32.mrb[8].mxu0 }
0x10cd   :  { %v1421_v53 = vmul.f32 0.25, %v2676_v52  ;;  %v1411_v54 = vpop.f32.mrb[9].mxu0  ;;  %v2877_v52 = vpack.c.bf16 %v2392_v51, %v2391_v50  ;;  %v2406_v51 = vld [vmem:[%s3653_s15 + $0x1] ss:$0 sm:$0xff] }
0x10ce   :  { %v1420_v55 = vmul.f32 0.25, %v1411_v54 }
0x10cf   :  { %v1423_v56 = vadd.f32 %v1421_v53, %v3318_v36 }
0x10d0   :  { %v1422_v57 = vadd.f32 %v1420_v55, %v3313_v33 }
0x10d1   :  { %v1427_v58 = vsel %vm443_vm9, %v1423_v56, -inf }
0x10d2   :  { %1428 = vmax.xlane.f32.xlu1 %v1427_v58  ;;  %v1424_v59 = vsel %vm443_vm9, %v1422_v57, -inf }
0x10d3   :  { %1425 = vmax.xlane.f32.xlu0 %v1424_v59 }
0x10d4   :  { %v2690_v24 = vpop.f32.mrb[10].mxu0 }
0x10d5   :  { %v1615_v60 = vpop.f32.mrb[11].mxu0  ;;  %v1625_v61 = vmul.f32 0.25, %v2690_v24 }
0x10d6   :  { %v1624_v62 = vmul.f32 0.25, %v1615_v60  ;;  %v2394_v60 = vld [vmem:[%s3649_s11 + $0x1] ss:$0 sm:$0xff] }
0x10d7   :  { %v1627_v14 = vadd.f32 %v1625_v61, %v3318_v36 }
0x10d8   :  { %v1626_v63 = vadd.f32 %v1624_v62, %v3313_v33 }
0x10d9   :  { %v1631_v12 = vsel %vm443_vm9, %v1627_v14, -inf }
0x10da   :  { %v1628_v0 = vsel %vm443_vm9, %v1626_v63, -inf }
0x10db   :  { %1629 = vmax.xlane.f32.xlu0 %v1628_v0 }
0x10df   :  { %1632 = vmax.xlane.f32.xlu0 %v1631_v12 }
0x115f   :  { %v1429_v1 = vpop.xlane.xlu1 %1428 }
0x1160   :  { %v1431_v2 = vsub.f32 %v1423_v56, %v1429_v1  ;;  %v1426_v3 = vpop.xlane.xlu0 %1425 }
0x1161   :  { %v1430_v4 = vsub.f32 %v1422_v57, %v1426_v3 }
0x1162   :  { %v1434_v5 = vmul.f32 1.442695, %v1431_v2 }
0x1163   :  { %v1432_v6 = vmul.f32 1.442695, %v1430_v4 }
0x1164   :  { %3006 = vpow2.f32 %v1434_v5 }
0x1165   :  { %3008 = vpow2.f32 %v1432_v6 }
0x1168   :  { %v1630_v7 = vpop.xlane.xlu0 %1629 }
0x1169   :  { %v1634_v8 = vsub.f32 %v1626_v63, %v1630_v7 }
0x116b   :  { %v1636_v9 = vmul.f32 1.442695, %v1634_v8 }
0x116c   :  { %v1633_v33 = vpop.xlane.xlu0 %1632 }
0x116d   :  { %3010 = vpow2.f32 %v1636_v9  ;;  %v1635_v10 = vsub.f32 %v1627_v14, %v1633_v33 }
0x116e   :  { %v3007_v11 = vpop.eup %3006 }
0x116f   :  { %v3009_v36 = vpop.eup %3008  ;;  %v1638_v13 = vmul.f32 1.442695, %v1635_v10  ;;  %v1439_v15 = vsel %vm443_vm9, %v3007_v11, 0.0 }
0x1170   :  { %1440 = vadd.xlane.f32.xlu0 %v1439_v15  ;;  %v1436_v16 = vsel %vm443_vm9, %v3009_v36, 0.0  ;;  %v2404_v15 = vld [vmem:[%s3652_s14 + $0x38] sm:$0xff] }
0x1171   :  { %3012 = vpow2.f32 %v1638_v13  ;;  %1437 = vadd.xlane.f32.xlu1 %v1436_v16  ;;  %v2403_v13 = vld [vmem:[%s3652_s14 + $0x30] sm:$0xff] }
0x1172   :  { %v2885_v16 = vpack.c.bf16 %v2404_v15, %v2403_v13 }
0x1177   :  { %v3011_v17 = vpop.eup %3010 }
0x1178   :  { %v1640_v18 = vsel %vm443_vm9, %v3011_v17, 0.0 }
0x1179   :  { %1641 = vadd.xlane.f32.xlu1 %v1640_v18 }
0x117b   :  { %v3013_v19 = vpop.eup %3012 }
0x117c   :  { %v1643_v21 = vsel %vm443_vm9, %v3013_v19, 0.0 }
0x117d   :  { %1644 = vadd.xlane.f32.xlu0 %v1643_v21 }
0x118a   :  { %2965 = vrot.lane.b32.xlu1 %v3462_v41, %s3063_s28 }
0x1193   :  { %2970 = vrot.lane.b32.xlu0 %v3462_v41, %s3066_s0 }
0x11fd   :  { %v1441_v23 = vpop.xlane.xlu0 %1440 }
0x11fe   :  { %v1438_v22 = vpop.xlane.xlu1 %1437 }
0x11ff   :  { %3014 = vrcp.f32 %v1438_v22 }
0x1200   :  { %3016 = vrcp.f32 %v1441_v23 }
0x1206   :  { %v1642_v25 = vpop.xlane.xlu1 %1641 }
0x1207   :  { %3018 = vrcp.f32 %v1642_v25 }
0x1209   :  { %v3015_v20 = vpop.eup %3014 }
0x120a   :  { %v2966_v26 = vpop.permute.xlu1 %2965  ;;  %v1645_v27 = vpop.xlane.xlu0 %1644  ;;  %v1444_v28 = vmul.f32 %v3015_v20, %v3009_v36  ;;  %v2399_v20 = vld [vmem:[%s3650_s12 + $0x1] ss:$0 sm:$0xff] }
0x120b   :  { %v2968_v30 = vunpack.i.h.bf16 %v2966_v26  ;;  %v2967_v31 = vunpack.i.l.bf16 %v2966_v26  ;;  %3020 = vrcp.f32 %v1645_v27  ;;  %v3017_v37 = vpop.eup %3016  ;;  %v2400_v27 = vld [vmem:[%s3651_s13 + $0x1] ss:$0 sm:$0xff] }
0x120c   :  { %2681 = vmatprep.mubr.msk.f32.mxu1 %vm443_vm9, %v1444_v28  ;;  %v1445_v42 = vmul.f32 %v3017_v37, %v3007_v11  ;;  %v2402_v11 = vld [vmem:[%s3652_s14 + $0x28] sm:$0xff] }
0x120d   :  { %v2859_v35 = vpack.c.bf16 %v2968_v30, %v2967_v31 }
0x120e   :  { %v2971_v38 = vpop.permute.xlu0 %2970 }
0x120f   :  { %v2973_v39 = vunpack.i.h.bf16 %v2971_v38  ;;  %v2972_v40 = vunpack.i.l.bf16 %v2971_v38  ;;  %2860 = vmatprep.subr.bf16.mxu1 %v2859_v35 }
0x1210   :  { %2862 = vmatpush3.bf16.msra.mxu1 %v2859_v35 }
0x1211   :  { %v3019_v41 = vpop.eup %3018  ;;  %v2869_v43 = vpack.c.bf16 %v2973_v39, %v2972_v40  ;;  %v2409_v39 = vld [vmem:[%s3654_s16 + $0x40] sm:$0xff]  ;;  %v2410_v40 = vld [vmem:[%s3654_s16 + $0x48] sm:$0xff] }
0x1212   :  { %v1648_v44 = vmul.f32 %v3019_v41, %v3011_v17  ;;  %v2889_v41 = vpack.c.bf16 %v2410_v40, %v2409_v39  ;;  %v2424_v40 = vld [vmem:[%s3657_s19 + $0x1] ss:$0 sm:$0xff] }
0x1213   :  { %2682 = vmatmul.mubr.msk.f32.vlgmr.msra.gmra.mrb[14].mxu1 %vm443_vm9, %v1445_v42  ;;  %2870 = vmatprep.subr.bf16.mxu1 %v2869_v43  ;;  %v2411_v42 = vld [vmem:[%s3654_s16 + $0x50] sm:$0xff] }
0x1214   :  { %2872 = vmatpush3.bf16.msra.mxu1 %v2869_v43  ;;  %2695 = vmatprep.mubr.msk.f32.mxu1 %vm443_vm9, %v1648_v44  ;;  %v2412_v43 = vld [vmem:[%s3654_s16 + $0x58] sm:$0xff] }
0x1215   :  { %v3021_v45 = vpop.eup %3020  ;;  %2874 = vmatprep.subr.bf16.mxu1 %v2873_v49  ;;  %v2893_v44 = vpack.c.bf16 %v2412_v43, %v2411_v42 }
0x1216   :  { %v1649_v46 = vmul.f32 %v3021_v45, %v3013_v19  ;;  %v2413_v45 = vld [vmem:[%s3654_s16 + $0x60] sm:$0xff] }
0x1218   :  { %2696 = vmatmul.mubr.msk.f32.vlgmr.msra.gmra.mrb[16].mxu1 %vm443_vm9, %v1649_v46  ;;  %v2414_v46 = vld [vmem:[%s3654_s16 + $0x68] sm:$0xff] }
0x1219   :  { %2876 = vmatpush3.bf16.msra.mxu1 %v2873_v49  ;;  %v2897_v47 = vpack.c.bf16 %v2414_v46, %v2413_v45  ;;  %v2416_v49 = vld [vmem:[%s3654_s16 + $0x78] sm:$0xff] }
0x121a   :  { %2878 = vmatprep.subr.bf16.mxu1 %v2877_v52  ;;  %v2901_v50 = vpack.c.bf16 %v2416_v49, %v2415_v48  ;;  %v2230_v48 = vld [vmem:[%s3660_s22 + $0x8] sm:$0xff]  ;;  %v2231_v49 = vld [vmem:[%s3660_s22 + $0x10] sm:$0xff] }
0x121d   :  { %2880 = vmatpush3.bf16.msra.mxu1 %v2877_v52 }
0x121e   :  { %2890 = vmatprep.subr.bf16.mxu1 %v2889_v41 }
0x12e6   :  { %v2683_v53 = vpop.f32.mrb[14].mxu1 }
0x12e7   :  { %v1524_v54 = vpop.f32.mrb[15].mxu1 }
0x12eb   :  { %v2697_v55 = vpop.f32.mrb[16].mxu1 }
0x12ec   :  { %v1728_v56 = vpop.f32.mrb[17].mxu1 }
0x12ed   :  { %1739 = vrot.lane.b32.xlu1 %v1728_v56, %s3067_s3 }
0x12f1   :  { %1741 = vrot.lane.b32.xlu1 %v2697_v55, %s3067_s3 }
0x135f   :  { %v1740_v57 = vpop.permute.xlu1 %1739 }
0x1360   :  { %v1745_v58 = vsel %vm443_vm9, %v1524_v54, %v1740_v57 }
0x1361   :  { %2706 = vmatprep.mubr.msk.f32.mxu1 %vm299_vm8, %v1745_v58 }
0x1363   :  { %v1742_v59 = vpop.permute.xlu1 %1741 }
0x1364   :  { %v1746_v24 = vsel %vm443_vm9, %v2683_v53, %v1742_v59 }
0x1365   :  { %2707 = vmatmul.mubr.msk.f32.vlgmr.msra.gmra.mrb[18].mxu1 %vm299_vm8, %v1746_v24 }
0x1366   :  { %2892 = vmatpush3.bf16.msra.mxu1 %v2889_v41 }
0x1367   :  { %2894 = vmatprep.subr.bf16.mxu1 %v2893_v44 }
0x136a   :  { %2896 = vmatpush3.bf16.msra.mxu1 %v2893_v44 }
0x136b   :  { %2898 = vmatprep.subr.bf16.mxu1 %v2897_v47 }
0x136e   :  { %2900 = vmatpush3.bf16.msra.mxu1 %v2897_v47  ;;  %v2229_v47 = vld [vmem:[%s3660_s22] sm:$0xff] }
0x136f   :  { %2902 = vmatprep.subr.bf16.mxu1 %v2901_v50 }
0x1372   :  { %2904 = vmatpush3.bf16.msra.mxu1 %v2901_v50  ;;  %v2912_v50 = vpack.c.bf16 %v2230_v48, %v2229_v47 }
0x1438   :  { %v2708_v61 = vpop.f32.mrb[18].mxu1 }
0x1439   :  { %v1838_v62 = vadd.f32 %v2708_v61, %v2394_v60  ;;  %v1832_v63 = vpop.f32.mrb[19].mxu1 }
0x143a   :  { %v1833_v0 = vadd.f32 %v2394_v60, %v1832_v63 }
0x143b   :  { %v1842_v14 = vadd.f32 %v1838_v62, %v3452_v34 }
0x143c   :  { %v1841_v12 = vadd.f32 %v1833_v0, %v3450_v32  ;;  %v2401_v32 = vld [vmem:[%s3652_s14 + $0x20] sm:$0xff] }
0x143d   :  { %v1850_v1 = vsel %vm299_vm8, %v1842_v14, 0.0  ;;  %v2881_v36 = vpack.c.bf16 %v2402_v11, %v2401_v32 }
0x143e   :  { %1851 = vadd.xlane.f32.xlu1 %v1850_v1  ;;  %v1847_v2 = vsel %vm299_vm8, %v1841_v12, 0.0 }
0x143f   :  { %1848 = vadd.xlane.f32.xlu0 %v1847_v2  ;;  %2882 = vmatprep.subr.bf16.mxu0 %v2881_v36 }
0x1440   :  { %2884 = vmatpush3.bf16.msra.mxu0 %v2881_v36 }
0x1441   :  { %2886 = vmatprep.subr.bf16.mxu0 %v2885_v16 }
0x1444   :  { %2888 = vmatpush3.bf16.msra.mxu0 %v2885_v16  ;;  %v2144_v16 = vld [vmem:[%s3658_s20] sm:$0xff] }
0x14cb   :  { %v1852_v3 = vpop.xlane.xlu1 %1851 }
0x14cc   :  { %v1854_v4 = vmul.f32 0.03125, %v1852_v3  ;;  %v1849_v5 = vpop.xlane.xlu0 %1848 }
0x14cd   :  { %v1853_v6 = vmul.f32 0.03125, %v1849_v5 }
0x14ce   :  { %v1856_v7 = vsub.f32 %v1842_v14, %v1854_v4  ;;  %v2418_v14 = vld [vmem:[%s3655_s17 + $0x1] ss:$0 sm:$0xff] }
0x14cf   :  { %v1855_v8 = vsub.f32 %v1841_v12, %v1853_v6 }
0x14d0   :  { %v1858_v10 = vmul.f32 %v1856_v7, %v1856_v7 }
0x14d1   :  { %v1857_v9 = vmul.f32 %v1855_v8, %v1855_v8 }
0x14d2   :  { %v1862_v34 = vsel %vm299_vm8, %v1858_v10, 0.0 }
0x14d3   :  { %v1859_v33 = vsel %vm299_vm8, %v1857_v9, 0.0 }
0x14d4   :  { %1860 = vadd.xlane.f32.xlu0 %v1859_v33 }
0x14d8   :  { %1863 = vadd.xlane.f32.xlu0 %v1862_v34 }
0x1561   :  { %v1861_v17 = vpop.xlane.xlu0 %1860 }
0x1562   :  { %v1865_v18 = vmul.f32 0.03125, %v1861_v17  ;;  %v2145_v17 = vld [vmem:[%s3658_s20 + $0x8] sm:$0xff] }
0x1564   :  { %v1867_v19 = vadd.f32 1e-12, %v1865_v18  ;;  %v2906_v18 = vpack.c.bf16 %v2145_v17, %v2144_v16 }
0x1565   :  { %v1864_v21 = vpop.xlane.xlu0 %1863 }
0x1566   :  { %3022 = vrsqrt.f32 %v1867_v19  ;;  %v1866_v22 = vmul.f32 0.03125, %v1864_v21  ;;  %v3068_v19 = vmov 0.0|0.0   ;;  %v2146_v21 = vld [vmem:[%s3658_s20 + $0x10] sm:$0xff] }
0x1567   :  { %2905 = vmatprep.subr.bf16.mxu0 %v3068_v19 }
0x1568   :  { %v1868_v23 = vadd.f32 1e-12, %v1866_v22  ;;  %v2147_v22 = vld [vmem:[%s3658_s20 + $0x18] sm:$0xff] }
0x156a   :  { %3024 = vrsqrt.f32 %v1868_v23  ;;  %v2909_v23 = vpack.c.bf16 %v2147_v22, %v2146_v21 }
0x1570   :  { %v3023_v25 = vpop.eup %3022 }
0x1571   :  { %v1871_v26 = vmul.f32 %v3023_v25, %v1855_v8 }
0x1573   :  { %v1879_v28 = vmul.f32 %v2399_v20, %v1871_v26 }
0x1574   :  { %v3025_v30 = vpop.eup %3024 }
0x1575   :  { %v1872_v31 = vmul.f32 %v3025_v30, %v1856_v7  ;;  %v1887_v35 = vadd.f32 %v2400_v27, %v1879_v28 }
0x1577   :  { %v1880_v37 = vmul.f32 %v2399_v20, %v1872_v31  ;;  %2717 = vmatprep.mubr.msk.f32.mxu0 %vm299_vm8, %v1887_v35 }
0x1579   :  { %v1888_v38 = vadd.f32 %v2400_v27, %v1880_v37 }
0x157b   :  { %2718 = vmatmul.mubr.msk.f32.vlgmr.msra.gmra.mrb[12].mxu0 %vm299_vm8, %v1888_v38 }
0x157c   :  { %2907 = vmatpush3.bf16.msra.mxu0 %v2906_v18  ;;  %2747 = vmatprep.mubr.msk.f32.mxu0 %vm3069_vm12, %v3061_v29 }
0x157d   :  { %2908 = vmatprep.subr.bf16.mxu0 %v3068_v19 }
0x1580   :  { %2910 = vmatpush3.bf16.msra.mxu0 %v2909_v23 }
0x1581   :  { %2911 = vmatprep.subr.bf16.mxu0 %v3068_v19 }
0x164e   :  { %v2719_v52 = vpop.f32.mrb[12].mxu0 }
0x164f   :  { %v1980_v53 = vadd.f32 %v2719_v52, %v2406_v51  ;;  %v1974_v54 = vpop.f32.mrb[13].mxu0 }
0x1650   :  { %v1975_v55 = vadd.f32 %v2406_v51, %v1974_v54  ;;  %v2232_v51 = vld [vmem:[%s3660_s22 + $0x18] sm:$0xff]  ;;  %s3070_s22 = smov [#allocation2]  }
0x1651   :  { %v1986_v56 = vmul.f32 0.70710677, %v1980_v53  ;;  %v1984_v62 = vmul.f32 0.5, %v1980_v53  ;;  %v2915_v52 = vpack.c.bf16 %v2232_v51, %v2231_v49  ;;  %s2321_s9 = sshll.u32 %s3070_s22, 4  ;;  %s2322_s9 = int_to_ptr.vmem [resolvable:$true] %s2321_s9 }
0x1652   :  { %v1985_v57 = vmul.f32 0.70710677, %v1975_v55  ;;  %v1983_v60 = vmul.f32 0.5, %v1975_v55  ;;  %p3041_p1 = scmp.lt.s32.totalorder %s2322_s9, %s2322_s9 }
0x1653   :  { %3026 = verf.f32 %v1986_v56 }
0x1654   :  { %3028 = verf.f32 %v1985_v57  ;;  %v2427_v57 = vld [vmem:[%s3661_s23] ss:$0 sm:$0xff] }
0x165d   :  { %v3027_v58 = vpop.eup %3026 }
0x165e   :  { %v3029_v59 = vpop.eup %3028  ;;  %v1990_v24 = vadd.f32 1.0, %v3027_v58 }
0x165f   :  { %v1989_v61 = vadd.f32 1.0, %v3029_v59 }
0x1660   :  { %v1992_v0 = vmul.f32 %v1990_v24, %v1984_v62 }
0x1661   :  { %v1991_v63 = vmul.f32 %v1989_v61, %v1983_v60 }
0x1663   :  { %2736 = vmatprep.mubr.msk.f32.mxu1 %vm1109_vm11, %v1991_v63 }
0x1664   :  { %2737 = vmatmul.mubr.msk.f32.vlgmr.msra.gmra.mrb[20].mxu1 %vm1109_vm11, %v1992_v0 }
0x1737   :  { %v2738_v12 = vpop.f32.mrb[20].mxu1 }
0x1738   :  { %v2088_v1 = vadd.f32 %v2738_v12, %v2418_v14  ;;  %v2082_v2 = vpop.f32.mrb[21].mxu1 }
0x1739   :  { %v2083_v3 = vadd.f32 %v2418_v14, %v2082_v2 }
0x173a   :  { %v2092_v4 = vadd.f32 %v2088_v1, %v1888_v38 }
0x173b   :  { %v2091_v5 = vadd.f32 %v2083_v3, %v1887_v35  ;;  %v2423_v35 = vld [vmem:[%s3656_s18 + $0x1] ss:$0 sm:$0xff] }
0x173c   :  { %v2100_v6 = vsel %vm299_vm8, %v2092_v4, 0.0 }
0x173d   :  { %2101 = vadd.xlane.f32.xlu1 %v2100_v6  ;;  %v2097_v7 = vsel %vm299_vm8, %v2091_v5, 0.0 }
0x173e   :  { %2098 = vadd.xlane.f32.xlu0 %v2097_v7 }
0x17ca   :  { %v2102_v8 = vpop.xlane.xlu1 %2101 }
0x17cb   :  { %v2104_v9 = vmul.f32 0.03125, %v2102_v8  ;;  %v2099_v33 = vpop.xlane.xlu0 %2098 }
0x17cc   :  { %v2103_v10 = vmul.f32 0.03125, %v2099_v33 }
0x17cd   :  { %v2106_v34 = vsub.f32 %v2092_v4, %v2104_v9 }
0x17ce   :  { %v2105_v32 = vsub.f32 %v2091_v5, %v2103_v10 }
0x17cf   :  { %v2108_v11 = vmul.f32 %v2106_v34, %v2106_v34 }
0x17d0   :  { %v2107_v36 = vmul.f32 %v2105_v32, %v2105_v32 }
0x17d1   :  { %v2112_v13 = vsel %vm299_vm8, %v2108_v11, 0.0 }
0x17d2   :  { %2113 = vadd.xlane.f32.xlu1 %v2112_v13  ;;  %v2109_v15 = vsel %vm299_vm8, %v2107_v36, 0.0 }
0x17d3   :  { %2110 = vadd.xlane.f32.xlu0 %v2109_v15 }
0x185f   :  { %v2114_v25 = vpop.xlane.xlu1 %2113 }
0x1860   :  { %v2116_v20 = vmul.f32 0.03125, %v2114_v25  ;;  %v2111_v26 = vpop.xlane.xlu0 %2110 }
0x1861   :  { %v2115_v27 = vmul.f32 0.03125, %v2111_v26 }
0x1862   :  { %v2118_v28 = vadd.f32 1e-12, %v2116_v20 }
0x1863   :  { %v2117_v30 = vadd.f32 1e-12, %v2115_v27 }
0x1864   :  { %3030 = vrsqrt.f32 %v2118_v28 }
0x1865   :  { %3032 = vrsqrt.f32 %v2117_v30 }
0x186e   :  { %v3031_v31 = vpop.eup %3030 }
0x186f   :  { %v3033_v37 = vpop.eup %3032  ;;  %v2122_v38 = vmul.f32 %v3031_v31, %v2106_v34 }
0x1870   :  { %v2121_v39 = vmul.f32 %v3033_v37, %v2105_v32 }
0x1871   :  { %v2130_v41 = vmul.f32 %v2423_v35, %v2122_v38 }
0x1872   :  { %v2129_v42 = vmul.f32 %v2423_v35, %v2121_v39 }
0x1873   :  { %v2138_v43 = vadd.f32 %v2424_v40, %v2130_v41 }
0x1874   :  { %v2137_v44 = vadd.f32 %v2424_v40, %v2129_v42 }
0x1875   :  { %v2140_v45 = vrot.slane %v2138_v43, 7 }
0x1877   :  { %v2143_v46 = vsel %vm2142_vm13, %v2137_v44, %v2140_v45 }
0x1878   :  { %2748 = vmatmul.mubr.msk.f32.vlgmr.msra.gmra.mrb[14].mxu0 %vm299_vm8, %v2143_v46 }
0x1879   :  { %2758 = vmatprep.mubr.msk.f32.mxu0 %vm3069_vm12, %v3061_v29  ;;  %2913 = vmatpush3.bf16.msra.mxu0 %v2912_v50  ;;  %v2425_v29 = vld [vmem:[%s3659_s21] ss:$0 sm:$0xff]  ;;  %s3036_s21 = scalar_lea.vmem %s2322_s9, 32 }
0x187a   :  { %2914 = vmatprep.subr.bf16.mxu0 %v3068_v19  ;;  %p3037_p0 = scmp.ne.s32.totalorder %s2322_s9, %s3036_s21  ;;  %p3042_p2 = scmp.lt.s32.totalorder %s3036_s21, %s3036_s21 }
0x187c   :  { %p3043_p3 = por %p3042_p2, %p3041_p1 }
0x187d   :  { %2916 = vmatpush3.bf16.msra.mxu0 %v2915_v52 }
0x187e   :  { %p3044_p4 = pnand %p3043_p3, %p3037_p0 }
0x194b   :  { %v2224_v53 = vpop.f32.mrb[14].mxu0 }
0x194c   :  { %v2225_v54 = vadd.f32 %v2425_v29, %v2224_v53  ;;  %v2749_v55 = vpop.f32.mrb[15].mxu0 }
0x194e   :  { %3034 = vtanh.f32 %v2225_v54 }
0x1958   :  { %v3035_v56 = vpop.eup %3034 }
0x1959   :  { %2759 = vmatmul.mubr.msk.f32.vlgmr.msra.gmra.mrb[16].mxu0 %vm299_vm8, %v3035_v56 }
0x1a2c   :  { %v2309_v58 = vpop.f32.mrb[16].mxu0 }
0x1a2d   :  { %v2310_v59 = vadd.f32 %v2427_v57, %v2309_v58  ;;  %v2760_v24 = vpop.f32.mrb[17].mxu0 }
0x1a2f   :  { %2314 = vst.msk [vmem:[#allocation2] sm:$0x3] %vm2313_vm14, %v2310_v59 }
0x1a30   :  { %3047 = shalt.err (!%p3044_p4)
}
0x1a31   :  { %s3048_s17 = scalar_lea.hbm %s3662_s24, 32 }
0x1a32   :  { %p3049_p5 = scmp.ne.s32.totalorder %s3662_s24, %s3048_s17  ;;  %p3052_p6 = scmp.lt.u32.totalorder %s3048_s17, %s3662_s24 }
0x1a34   :  { %p3054_p7 = pnand %p3052_p6, %p3049_p5 }
0x1a36   :  { %3057 = shalt.err (!%p3054_p7)
}
0x1a37   :  { %2324 = dma.vmem_to_hbm [thread:$0]  %s2322_s9, 32, %s3662_s24, [#allocation3]  }
0x1a38   :  { %3058 = dma.done.wait [#allocation3], 32  }
0x1a39   :  { %3059 = vsyncadd [#allocation3], 4294967264 }
0x1a3a   :  { %2328 = vsyncpa [#allocation3], 1 }

</bundles_post_ra>
